<compile_context>
chip_gen: v7x
topology: tpu7x:2x2x1
jax: 0.10.0
libtpu: 0.0.40
codegen_flags: <defaults>
</compile_context>

<pallas_src>
import functools

import jax
import jax.numpy as jnp
from jax import lax
from jax.experimental import pallas as pl
from jax.experimental.pallas import tpu as pltpu


# --------------------------------------------------------------------------
# Fused decoder-stack kernel (all layers, whole batch)
# --------------------------------------------------------------------------

def _decoder_kernel(h0_ref, memraw_ref, am_ref, projw_ref,
                    ln1g_ref, ln1b_ref, wqkv_ref, bqkv_ref, wo_ref, bo_ref,
                    ln2g_ref, ln2b_ref, w1_ref, b1_ref, w2_ref, b2_ref,
                    o_ref, mem_scr, attn_scr,
                    *, B, M, T, H, Dh, eps):
    """One grid step == one transformer block applied to the whole batch.

    o_ref   : (B*T, D) f32 residual stream, resident across the L grid axis.
    mem_scr : (B*M, D) f32 projected latent prefix (computed once at l == 0).
    attn_scr: (B*T, D) f32 per-layer attention output staging buffer.
    """
    l = pl.program_id(0)
    D = H * Dh
    S = T + M
    BT = B * T

    @pl.when(l == 0)
    def _():
        # Initialize the resident residual stream and fold in proj_layer
        # (Linear(enc_out -> hidden), no bias) exactly once.
        o_ref[...] = h0_ref[...]
        mem_scr[...] = jnp.dot(memraw_ref[...].astype(jnp.bfloat16),
                               projw_ref[...],
                               preferred_element_type=jnp.float32)

    h = o_ref[...]                    # (B*T, D)
    mem = mem_scr[...]                # (B*M, D)
    am = am_ref[...]                  # (B, T) token padding mask (1 = keep)

    def layernorm(x, g, b):
        mu = jnp.mean(x, axis=-1, keepdims=True)
        var = jnp.mean(jnp.square(x - mu), axis=-1, keepdims=True)
        return (x - mu) * lax.rsqrt(var + eps) * g + b

    # ---- LN1 + fused QKV over [tokens ; memory] rows in ONE matmul --------
    xcat = jnp.concatenate([h, mem], axis=0)                       # (BT+BM, D)
    xn = layernorm(xcat, ln1g_ref[0], ln1b_ref[0])
    qkv = jnp.dot(xn.astype(jnp.bfloat16), wqkv_ref[0],
                  preferred_element_type=jnp.float32) + bqkv_ref[0]  # (.,3D)

    q = qkv[:BT, 0:D]
    k_t = qkv[:BT, D:2 * D]
    v_t = qkv[:BT, 2 * D:3 * D]
    k_m = qkv[BT:, D:2 * D]
    v_m = qkv[BT:, 2 * D:3 * D]

    # Key order per batch: [tokens(T) ; memory(M)]. Tokens are causal and
    # pad-masked; memory keys are always visible (matches the torch mask
    # cat([ones(B,M), attention_mask]) up to key ordering, which softmax
    # doesn't care about).
    col = lax.broadcasted_iota(jnp.int32, (T, S), 1)
    row = lax.broadcasted_iota(jnp.int32, (T, S), 0)
    causal_or_mem = jnp.logical_or(col >= T, col <= row)

    scale = 1.0 / (Dh ** 0.5)
    for b in range(B):                                  # static unroll (B=2)
        q_b = q[b * T:(b + 1) * T]                                  # (T, D)
        k_b = jnp.concatenate(
            [k_t[b * T:(b + 1) * T], k_m[b * M:(b + 1) * M]],
            axis=0).astype(jnp.bfloat16)                            # (S, D)
        v_b = jnp.concatenate(
            [v_t[b * T:(b + 1) * T], v_m[b * M:(b + 1) * M]],
            axis=0).astype(jnp.bfloat16)                            # (S, D)
        key_mask = jnp.concatenate(
            [am[b:b + 1, :], jnp.ones((1, M), jnp.float32)], axis=-1)  # (1,S)
        allowed = jnp.logical_and(causal_or_mem, key_mask > 0.5)
        mask_add = jnp.where(allowed, 0.0, -1e9)                    # (T, S)

        for hh in range(H):                             # static unroll (H=2)
            sl = slice(hh * Dh, (hh + 1) * Dh)
            s = lax.dot_general(q_b[:, sl].astype(jnp.bfloat16), k_b[:, sl],
                                (((1,), (1,)), ((), ())),
                                preferred_element_type=jnp.float32)  # (T, S)
            s = s * scale + mask_add
            s = s - jnp.max(s, axis=-1, keepdims=True)
            p = jnp.exp(s)
            p = p * pl.reciprocal(jnp.sum(p, axis=-1, keepdims=True),
                                  approx=True)
            # Write each head's (T, Dh) result straight into its slot.
            attn_scr[b * T:(b + 1) * T, sl] = jnp.dot(
                p.astype(jnp.bfloat16), v_b[:, sl],
                preferred_element_type=jnp.float32)

    # ---- output projection + residual --------------------------------------
    attn = attn_scr[...]                                            # (B*T, D)
    proj = jnp.dot(attn.astype(jnp.bfloat16), wo_ref[0],
                   preferred_element_type=jnp.float32) + bo_ref[0]
    h1 = h + proj

    # ---- LN2 + MLP + residual ----------------------------------------------
    yn = layernorm(h1, ln2g_ref[0], ln2b_ref[0])
    ff = jnp.dot(yn.astype(jnp.bfloat16), w1_ref[0],
                 preferred_element_type=jnp.float32) + b1_ref[0]
    ff = jax.nn.gelu(ff, approximate=True)              # GPT2 "gelu_new"
    ff2 = jnp.dot(ff.astype(jnp.bfloat16), w2_ref[0],
                  preferred_element_type=jnp.float32) + b2_ref[0]

    o_ref[...] = h1 + ff2


def pallas_decoder(h0, memflat, am, params, *, B, M, T, H, Dh, L, eps=1e-5):
    """All transformer blocks in one pallas_call. h0: (B*T,D), memflat: (B*M,E)."""
    D = H * Dh
    E = memflat.shape[1]
    kernel = functools.partial(_decoder_kernel, B=B, M=M, T=T, H=H, Dh=Dh,
                               eps=eps)

    def fixed(shape):
        nd = len(shape)
        return pl.BlockSpec(shape, lambda l, _n=nd: (0,) * _n)

    def per_layer(shape):
        nd = len(shape)
        return pl.BlockSpec((1,) + shape, lambda l, _n=nd: (l,) + (0,) * _n)

    # NOTE: at real GPT2 sizes on v7x, weights should additionally be
    # single-buffered / MLP-tiled to respect the 64 MiB VMEM; irrelevant here.
    return pl.pallas_call(
        kernel,
        out_shape=jax.ShapeDtypeStruct((B * T, D), jnp.float32),
        grid=(L,),
        in_specs=[
            fixed((B * T, D)),        # h0 (embeddings)
            fixed((B * M, E)),        # raw memory
            fixed((B, T)),            # token attention mask
            fixed((E, D)),            # proj_layer weight (bf16)
            per_layer((1, D)), per_layer((1, D)),          # ln1 g/b
            per_layer((D, 3 * D)), per_layer((1, 3 * D)),  # fused qkv
            per_layer((D, D)), per_layer((1, D)),          # output proj
            per_layer((1, D)), per_layer((1, D)),          # ln2 g/b
            per_layer((D, 4 * D)), per_layer((1, 4 * D)),  # mlp up
            per_layer((4 * D, D)), per_layer((1, D)),      # mlp down
        ],
        out_specs=pl.BlockSpec((B * T, D), lambda l: (0, 0)),
        scratch_shapes=[pltpu.VMEM((B * M, D), jnp.float32),   # projected mem
                        pltpu.VMEM((B * T, D), jnp.float32)],  # attn staging
        compiler_params=pltpu.CompilerParams(
            dimension_semantics=("arbitrary",)),
    )(h0, memflat, am, params["proj_w"],
      params["ln1_g"], params["ln1_b"], params["wqkv"], params["bqkv"],
      params["wo"], params["bo"], params["ln2_g"], params["ln2_b"],
      params["w1"], params["b1"], params["w2"], params["b2"])


# --------------------------------------------------------------------------
# Fused head kernel: final LN + tied LM head + argmax + summed masked xent
# --------------------------------------------------------------------------

def _head_kernel(h_ref, g_ref, b_ref, wte_t_ref, y_ref,
                 logits_ref, pred_ref, loss_ref, *, pad_idx, eps):
    h = h_ref[...]                                                 # (N, D)
    mu = jnp.mean(h, axis=-1, keepdims=True)
    var = jnp.mean(jnp.square(h - mu), axis=-1, keepdims=True)
    x = (h - mu) * lax.rsqrt(var + eps) * g_ref[...] + b_ref[...]

    # Tied LM head against pre-transposed (D, V) embedding: lane-dense output.
    logits = jnp.dot(x.astype(jnp.bfloat16), wte_t_ref[...],
                     preferred_element_type=jnp.float32)           # (N, V)
    logits_ref[...] = logits

    N, V = logits.shape
    m = jnp.max(logits, axis=-1, keepdims=True)                    # (N, 1)
    col = lax.broadcasted_iota(jnp.int32, (N, V), 1)

    # argmax (first max index, matching torch tie-breaking).
    pred_ref[...] = jnp.min(jnp.where(logits == m, col, V),
                            axis=-1, keepdims=True)                # (N, 1)

    # summed NLL over non-pad (already shifted) labels, exact LSE.
    y = y_ref[...]                                                 # (N, 1)
    lse = jnp.log(jnp.sum(jnp.exp(logits - m), axis=-1, keepdims=True)) + m
    tgt = jnp.sum(jnp.where(col == y, logits, 0.0), axis=-1, keepdims=True)
    valid = (y != pad_idx).astype(jnp.float32)
    loss_ref[...] = jnp.sum((lse - tgt) * valid, keepdims=True)    # (1, 1)


def pallas_head(h, lnf_g, lnf_b, wte_t, labels, *, pad_idx, eps=1e-5):
    """h: (N,D), wte_t: (D,V) bf16, labels: (N,1) -> (logits, pred, loss)."""
    N, D = h.shape
    V = wte_t.shape[1]
    kernel = functools.partial(_head_kernel, pad_idx=pad_idx, eps=eps)
    return pl.pallas_call(
        kernel,
        out_shape=(jax.ShapeDtypeStruct((N, V), jnp.float32),
                   jax.ShapeDtypeStruct((N, 1), jnp.int32),
                   jax.ShapeDtypeStruct((1, 1), jnp.float32)),
        grid=(1,),
        in_specs=[
            pl.BlockSpec((N, D), lambda i: (0, 0)),
            pl.BlockSpec((1, D), lambda i: (0, 0)),
            pl.BlockSpec((1, D), lambda i: (0, 0)),
            pl.BlockSpec((D, V), lambda i: (0, 0)),
            pl.BlockSpec((N, 1), lambda i: (0, 0)),
        ],
        out_specs=[
            pl.BlockSpec((N, V), lambda i: (0, 0)),
            pl.BlockSpec((N, 1), lambda i: (0, 0)),
            pl.BlockSpec((1, 1), lambda i: (0, 0)),
        ],
        compiler_params=pltpu.CompilerParams(
            dimension_semantics=("arbitrary",)),
    )(h, lnf_g, lnf_b, wte_t, labels)


# --------------------------------------------------------------------------
# Model config, parameters, forward
# --------------------------------------------------------------------------

CFG = dict(
    vocab=128,                 # synthetic GPT2 vocab
    enc_out=48,                # config.encoder_output_size
    hidden=32,                 # config.decoder_input_size (GPT2 n_embd)
    n_layer=2,
    n_head=2,
    seq_len=8,                 # config.seq_len / max_len
    mem_len=4,                 # latent "past" prefix length
    pad_idx=0,
    batch=2,
)


def init_params(key, cfg):
    V, E, D = cfg["vocab"], cfg["enc_out"], cfg["hidden"]
    M, T, L = cfg["mem_len"], cfg["seq_len"], cfg["n_layer"]
    Dm = 4 * D
    std = 0.02

    keys = iter(jax.random.split(key, 8))
    nrm = lambda shape: std * jax.random.normal(next(keys), shape, jnp.float32)

    # Matmul weights stored in bf16 (halves DMA bytes + removes in-kernel
    # casts); LN params, biases and the embedding table stay f32.
    return {
        "proj_w": nrm((E, D)).astype(jnp.bfloat16),     # proj_layer (no bias)
        "wte": nrm((V, D)),                             # tied embedding / head
        "wpe": nrm((M + T, D)),                         # position embedding
        "lnf_g": jnp.ones((1, D), jnp.float32),
        "lnf_b": jnp.zeros((1, D), jnp.float32),
        # per-layer weights stacked along a leading L axis
        "ln1_g": jnp.ones((L, 1, D), jnp.float32),
        "ln1_b": jnp.zeros((L, 1, D), jnp.float32),
        "wqkv": nrm((L, D, 3 * D)).astype(jnp.bfloat16),
        "bqkv": jnp.zeros((L, 1, 3 * D), jnp.float32),
        "wo": nrm((L, D, D)).astype(jnp.bfloat16),
        "bo": jnp.zeros((L, 1, D), jnp.float32),
        "ln2_g": jnp.ones((L, 1, D), jnp.float32),
        "ln2_b": jnp.zeros((L, 1, D), jnp.float32),
        "w1": nrm((L, D, Dm)).astype(jnp.bfloat16),
        "b1": jnp.zeros((L, 1, Dm), jnp.float32),
        "w2": nrm((L, Dm, D)).astype(jnp.bfloat16),
        "b2": jnp.zeros((L, 1, D), jnp.float32),
    }


def new_gpt_forward(params, memory, sentence_idx, attention_mask, cfg):
    """memory: (B,M,E) f32; sentence_idx: (B,T) int32; attention_mask: (B,T)."""
    B, M, E = memory.shape
    T = sentence_idx.shape[1]
    D, H, V, L = cfg["hidden"], cfg["n_head"], cfg["vocab"], cfg["n_layer"]
    Dh = D // H

    # Embedding gathers are glue; positions continue after the "past" prefix.
    tok = jnp.take(params["wte"], sentence_idx, axis=0)            # (B, T, D)
    pos = params["wpe"][M:M + T]                                   # (T, D)
    h0 = (tok + pos[None]).reshape(B * T, D)

    am = attention_mask.astype(jnp.float32)                        # (B, T)
    memflat = memory.reshape(B * M, E)

    # Single fused pallas_call: proj_layer + all transformer blocks.
    # TODO(synk): GPT2ForLatentConnector maps the latent to per-layer past K/V
    # with checkpoint-specific projections; here the memory is treated as
    # prefix hidden states re-projected by each layer's own LN/K/V weights.
    h_final = pallas_decoder(h0, memflat, am, params,
                             B=B, M=M, T=T, H=H, Dh=Dh, L=L)

    # Shifted labels: position t predicts token t+1; last position marked pad
    # so the ignore-mask drops it (matches label_ignore=pad_idx).
    labels_shift = jnp.concatenate(
        [sentence_idx[:, 1:],
         jnp.full((B, 1), cfg["pad_idx"], sentence_idx.dtype)], axis=1)
    labels2 = labels_shift.reshape(B * T, 1).astype(jnp.int32)

    wte_t = params["wte"].T.astype(jnp.bfloat16)                   # (D, V)

    logits_flat, pred_flat, loss = pallas_head(
        h_final, params["lnf_g"], params["lnf_b"], wte_t, labels2,
        pad_idx=cfg["pad_idx"])

    # 'sentences' would require the tokenizer (untranslatable) — omitted.
    return {"loss_reconstruct": loss.reshape(()),
            "pred_idx": pred_flat.reshape(B, T),
            "logprobs": logits_flat.reshape(B, T, V)}


# --------------------------------------------------------------------------
# Main
# --------------------------------------------------------------------------

if __name__ == "__main__":
    cfg = CFG
    B, M, E = cfg["batch"], cfg["mem_len"], cfg["enc_out"]
    T, V, PAD = cfg["seq_len"], cfg["vocab"], cfg["pad_idx"]

    key = jax.random.PRNGKey(0)
    k_par, k_mem, k_tok = jax.random.split(key, 3)

    params = init_params(k_par, cfg)
    memory = jax.random.normal(k_mem, (B, M, E), jnp.float32)
    sentence_idx = jax.random.randint(k_tok, (B, T), 1, V, dtype=jnp.int32)
    sentence_idx = sentence_idx.at[1, -2:].set(PAD)          # trailing pads
    attention_mask = (sentence_idx != PAD).astype(jnp.float32)

    fwd = jax.jit(functools.partial(new_gpt_forward, cfg=cfg))
    out = fwd(params, memory, sentence_idx, attention_mask)
    jax.block_until_ready(out)

    assert out["logprobs"].shape == (B, T, V)
    assert out["pred_idx"].shape == (B, T)
    assert out["loss_reconstruct"].shape == ()
    print("KERNEL_OK")
</pallas_src>

<mosaic_0001>
module attributes {stable_mosaic.version = 11 : i64} {
  func.func @_decoder_kernel(%arg0: i32, %arg1: memref<16x32xf32, #tpu.memory_space<vmem>>, %arg2: memref<8x48xf32, #tpu.memory_space<vmem>>, %arg3: memref<2x8xf32, #tpu.memory_space<vmem>>, %arg4: memref<48x32xbf16, #tpu.memory_space<vmem>>, %arg5: memref<1x1x32xf32, #tpu.memory_space<vmem>>, %arg6: memref<1x1x32xf32, #tpu.memory_space<vmem>>, %arg7: memref<1x32x96xbf16, #tpu.memory_space<vmem>>, %arg8: memref<1x1x96xf32, #tpu.memory_space<vmem>>, %arg9: memref<1x32x32xbf16, #tpu.memory_space<vmem>>, %arg10: memref<1x1x32xf32, #tpu.memory_space<vmem>>, %arg11: memref<1x1x32xf32, #tpu.memory_space<vmem>>, %arg12: memref<1x1x32xf32, #tpu.memory_space<vmem>>, %arg13: memref<1x32x128xbf16, #tpu.memory_space<vmem>>, %arg14: memref<1x1x128xf32, #tpu.memory_space<vmem>>, %arg15: memref<1x128x32xbf16, #tpu.memory_space<vmem>>, %arg16: memref<1x1x32xf32, #tpu.memory_space<vmem>>, %arg17: memref<16x32xf32, #tpu.memory_space<vmem>>, %arg18: memref<8x32xf32, #tpu.memory_space<vmem>>, %arg19: memref<16x32xf32, #tpu.memory_space<vmem>>) attributes {dimension_semantics = [#tpu.dimension_semantics<arbitrary>], iteration_bounds = array<i64: 2>, scalar_prefetch = 0 : i64, scratch_operands = 2 : i64, tpu.core_type = #tpu.core_type<tc>, window_params = [{pipeline_mode = #tpu.pipeline_mode<synchronous>, transform_indices = @transform_0, window_bounds = array<i64: 16, 32>}, {pipeline_mode = #tpu.pipeline_mode<synchronous>, transform_indices = @transform_1, window_bounds = array<i64: 8, 48>}, {pipeline_mode = #tpu.pipeline_mode<synchronous>, transform_indices = @transform_2, window_bounds = array<i64: 2, 8>}, {pipeline_mode = #tpu.pipeline_mode<synchronous>, transform_indices = @transform_3, window_bounds = array<i64: 48, 32>}, {transform_indices = @transform_4, window_bounds = array<i64: 1, 1, 32>}, {transform_indices = @transform_5, window_bounds = array<i64: 1, 1, 32>}, {transform_indices = @transform_6, window_bounds = array<i64: 1, 32, 96>}, {transform_indices = @transform_7, window_bounds = array<i64: 1, 1, 96>}, {transform_indices = @transform_8, window_bounds = array<i64: 1, 32, 32>}, {transform_indices = @transform_9, window_bounds = array<i64: 1, 1, 32>}, {transform_indices = @transform_10, window_bounds = array<i64: 1, 1, 32>}, {transform_indices = @transform_11, window_bounds = array<i64: 1, 1, 32>}, {transform_indices = @transform_12, window_bounds = array<i64: 1, 32, 128>}, {transform_indices = @transform_13, window_bounds = array<i64: 1, 1, 128>}, {transform_indices = @transform_14, window_bounds = array<i64: 1, 128, 32>}, {transform_indices = @transform_15, window_bounds = array<i64: 1, 1, 32>}, {pipeline_mode = #tpu.pipeline_mode<synchronous>, transform_indices = @transform_16, window_bounds = array<i64: 16, 32>}]} {
    %c0_i32 = arith.constant 0 : i32
    %0 = arith.cmpi eq, %arg0, %c0_i32 : i32
    %1 = arith.extui %0 : i1 to i32
    %c0_i32_0 = arith.constant 0 : i32
    %2 = arith.cmpi ne, %1, %c0_i32_0 : i32
    scf.if %2 {
      %c0_97 = arith.constant 0 : index
      %c0_98 = arith.constant 0 : index
      %241 = vector.load %arg1[%c0_97, %c0_98] : memref<16x32xf32, #tpu.memory_space<vmem>>, vector<16x32xf32>
      %c0_99 = arith.constant 0 : index
      %c0_100 = arith.constant 0 : index
      %242 = vector.load %arg17[%c0_99, %c0_100] : memref<16x32xf32, #tpu.memory_space<vmem>>, vector<16x32xf32>
      tpu.vector_store %arg17[%c0_99, %c0_100], %241 {strides = array<i32>} : memref<16x32xf32, #tpu.memory_space<vmem>>, vector<16x32xf32>,
      %c0_101 = arith.constant 0 : index
      %c0_102 = arith.constant 0 : index
      %243 = vector.load %arg2[%c0_101, %c0_102] : memref<8x48xf32, #tpu.memory_space<vmem>>, vector<8x48xf32>
      %244 = arith.truncf %243 : vector<8x48xf32> to vector<8x48xbf16>
      %c0_103 = arith.constant 0 : index
      %c0_104 = arith.constant 0 : index
      %245 = vector.load %arg4[%c0_103, %c0_104] : memref<48x32xbf16, #tpu.memory_space<vmem>>, vector<48x32xbf16>
      %cst_105 = arith.constant dense<0.000000e+00> : vector<8x32xf32>
      %246 = tpu.matmul %244, %245, %cst_105 {dimension_numbers = #tpu.dot_dimension_numbers<[1], [0], [0], [1], [0, 0, 1, 1], [], []>} : vector<8x48xbf16>, vector<48x32xbf16>, vector<8x32xf32> -> vector<8x32xf32>
      %c0_106 = arith.constant 0 : index
      %c0_107 = arith.constant 0 : index
      %247 = vector.load %arg18[%c0_106, %c0_107] : memref<8x32xf32, #tpu.memory_space<vmem>>, vector<8x32xf32>
      tpu.vector_store %arg18[%c0_106, %c0_107], %246 {strides = array<i32>} : memref<8x32xf32, #tpu.memory_space<vmem>>, vector<8x32xf32>,
    } else {
    }
    %c0 = arith.constant 0 : index
    %c0_1 = arith.constant 0 : index
    %3 = vector.load %arg17[%c0, %c0_1] : memref<16x32xf32, #tpu.memory_space<vmem>>, vector<16x32xf32>
    %c0_2 = arith.constant 0 : index
    %c0_3 = arith.constant 0 : index
    %4 = vector.load %arg18[%c0_2, %c0_3] : memref<8x32xf32, #tpu.memory_space<vmem>>, vector<8x32xf32>
    %c0_4 = arith.constant 0 : index
    %c0_5 = arith.constant 0 : index
    %5 = vector.load %arg3[%c0_4, %c0_5] : memref<2x8xf32, #tpu.memory_space<vmem>>, vector<2x8xf32>
    %6 = tpu.concatenate %3, %4 in 0 : vector<16x32xf32>, vector<8x32xf32> -> vector<24x32xf32>
    %c0_6 = arith.constant 0 : index
    %c0_7 = arith.constant 0 : index
    %c0_8 = arith.constant 0 : index
    %7 = vector.load %arg5[%c0_6, %c0_7, %c0_8] : memref<1x1x32xf32, #tpu.memory_space<vmem>>, vector<1x1x32xf32>
    %8 = vector.shape_cast %7 : vector<1x1x32xf32> to vector<1x32xf32>
    %c0_9 = arith.constant 0 : index
    %c0_10 = arith.constant 0 : index
    %c0_11 = arith.constant 0 : index
    %9 = vector.load %arg6[%c0_9, %c0_10, %c0_11] : memref<1x1x32xf32, #tpu.memory_space<vmem>>, vector<1x1x32xf32>
    %10 = vector.shape_cast %9 : vector<1x1x32xf32> to vector<1x32xf32>
    %cst = arith.constant dense<0.000000e+00> : vector<24xf32>
    %11 = vector.multi_reduction <add>, %6, %cst [1] : vector<24x32xf32> to vector<24xf32>
    %12 = vector.shape_cast %11 : vector<24xf32> to vector<24x1xf32>
    %cst_12 = arith.constant 3.200000e+01 : f32
    %13 = vector.broadcast %cst_12 : f32 to vector<24x1xf32>
    %14 = arith.divf %12, %13 : vector<24x1xf32>
    %15 = vector.broadcast %14 : vector<24x1xf32> to vector<24x32xf32>
    %16 = arith.subf %6, %15 : vector<24x32xf32>
    %17 = arith.mulf %16, %16 : vector<24x32xf32>
    %cst_13 = arith.constant dense<0.000000e+00> : vector<24xf32>
    %18 = vector.multi_reduction <add>, %17, %cst_13 [1] : vector<24x32xf32> to vector<24xf32>
    %19 = vector.shape_cast %18 : vector<24xf32> to vector<24x1xf32>
    %cst_14 = arith.constant 3.200000e+01 : f32
    %20 = vector.broadcast %cst_14 : f32 to vector<24x1xf32>
    %21 = arith.divf %19, %20 : vector<24x1xf32>
    %22 = vector.broadcast %14 : vector<24x1xf32> to vector<24x32xf32>
    %23 = arith.subf %6, %22 : vector<24x32xf32>
    %cst_15 = arith.constant 9.99999974E-6 : f32
    %24 = vector.broadcast %cst_15 : f32 to vector<24x1xf32>
    %25 = arith.addf %21, %24 : vector<24x1xf32>
    %26 = math.rsqrt %25 : vector<24x1xf32>
    %27 = vector.broadcast %26 : vector<24x1xf32> to vector<24x32xf32>
    %28 = arith.mulf %23, %27 : vector<24x32xf32>
    %29 = vector.broadcast %8 : vector<1x32xf32> to vector<24x32xf32>
    %30 = arith.mulf %28, %29 : vector<24x32xf32>
    %31 = vector.broadcast %10 : vector<1x32xf32> to vector<24x32xf32>
    %32 = arith.addf %30, %31 : vector<24x32xf32>
    %33 = arith.truncf %32 : vector<24x32xf32> to vector<24x32xbf16>
    %c0_16 = arith.constant 0 : index
    %c0_17 = arith.constant 0 : index
    %c0_18 = arith.constant 0 : index
    %34 = vector.load %arg7[%c0_16, %c0_17, %c0_18] : memref<1x32x96xbf16, #tpu.memory_space<vmem>>, vector<1x32x96xbf16>
    %35 = vector.shape_cast %34 : vector<1x32x96xbf16> to vector<32x96xbf16>
    %cst_19 = arith.constant dense<0.000000e+00> : vector<24x96xf32>
    %36 = tpu.matmul %33, %35, %cst_19 {dimension_numbers = #tpu.dot_dimension_numbers<[1], [0], [0], [1], [0, 0, 1, 1], [], []>} : vector<24x32xbf16>, vector<32x96xbf16>, vector<24x96xf32> -> vector<24x96xf32>
    %c0_20 = arith.constant 0 : index
    %c0_21 = arith.constant 0 : index
    %c0_22 = arith.constant 0 : index
    %37 = vector.load %arg8[%c0_20, %c0_21, %c0_22] : memref<1x1x96xf32, #tpu.memory_space<vmem>>, vector<1x1x96xf32>
    %38 = vector.shape_cast %37 : vector<1x1x96xf32> to vector<1x96xf32>
    %39 = vector.broadcast %38 : vector<1x96xf32> to vector<24x96xf32>
    %40 = arith.addf %36, %39 : vector<24x96xf32>
    %41 = vector.extract_strided_slice %40 {offsets = [0, 0], sizes = [16, 32], strides = [1, 1]} : vector<24x96xf32> to vector<16x32xf32>
    %42 = vector.extract_strided_slice %40 {offsets = [0, 32], sizes = [16, 32], strides = [1, 1]} : vector<24x96xf32> to vector<16x32xf32>
    %43 = vector.extract_strided_slice %40 {offsets = [0, 64], sizes = [16, 32], strides = [1, 1]} : vector<24x96xf32> to vector<16x32xf32>
    %44 = vector.extract_strided_slice %40 {offsets = [16, 32], sizes = [8, 32], strides = [1, 1]} : vector<24x96xf32> to vector<8x32xf32>
    %45 = vector.extract_strided_slice %40 {offsets = [16, 64], sizes = [8, 32], strides = [1, 1]} : vector<24x96xf32> to vector<8x32xf32>
    %46 = tpu.iota {dimensions = array<i32: 1>} : vector<8x12xi32>
    %47 = tpu.iota {dimensions = array<i32: 0>} : vector<8x12xi32>
    %c8_i32 = arith.constant 8 : i32
    %48 = vector.broadcast %c8_i32 : i32 to vector<8x12xi32>
    %49 = arith.cmpi sge, %46, %48 : vector<8x12xi32>
    %50 = arith.cmpi sle, %46, %47 : vector<8x12xi32>
    %51 = arith.ori %49, %50 : vector<8x12xi1>
    %52 = vector.extract_strided_slice %41 {offsets = [0, 0], sizes = [8, 32], strides = [1, 1]} : vector<16x32xf32> to vector<8x32xf32>
    %53 = vector.extract_strided_slice %42 {offsets = [0, 0], sizes = [8, 32], strides = [1, 1]} : vector<16x32xf32> to vector<8x32xf32>
    %54 = vector.extract_strided_slice %44 {offsets = [0, 0], sizes = [4, 32], strides = [1, 1]} : vector<8x32xf32> to vector<4x32xf32>
    %55 = tpu.concatenate %53, %54 in 0 : vector<8x32xf32>, vector<4x32xf32> -> vector<12x32xf32>
    %56 = arith.truncf %55 : vector<12x32xf32> to vector<12x32xbf16>
    %57 = vector.extract_strided_slice %43 {offsets = [0, 0], sizes = [8, 32], strides = [1, 1]} : vector<16x32xf32> to vector<8x32xf32>
    %58 = vector.extract_strided_slice %45 {offsets = [0, 0], sizes = [4, 32], strides = [1, 1]} : vector<8x32xf32> to vector<4x32xf32>
    %59 = tpu.concatenate %57, %58 in 0 : vector<8x32xf32>, vector<4x32xf32> -> vector<12x32xf32>
    %60 = arith.truncf %59 : vector<12x32xf32> to vector<12x32xbf16>
    %61 = vector.extract_strided_slice %5 {offsets = [0, 0], sizes = [1, 8], strides = [1, 1]} : vector<2x8xf32> to vector<1x8xf32>
    %cst_23 = arith.constant 1.000000e+00 : f32
    %62 = vector.broadcast %cst_23 : f32 to vector<1x4xf32>
    %63 = tpu.concatenate %61, %62 in 1 : vector<1x8xf32>, vector<1x4xf32> -> vector<1x12xf32>
    %cst_24 = arith.constant 5.000000e-01 : f32
    %64 = vector.broadcast %cst_24 : f32 to vector<1x12xf32>
    %65 = arith.cmpf ogt, %63, %64 : vector<1x12xf32>
    %66 = vector.broadcast %65 : vector<1x12xi1> to vector<8x12xi1>
    %67 = arith.andi %51, %66 : vector<8x12xi1>
    %cst_25 = arith.constant 0.000000e+00 : f32
    %cst_26 = arith.constant -1.000000e+09 : f32
    %68 = vector.broadcast %cst_25 : f32 to vector<8x12xf32>
    %69 = vector.broadcast %cst_26 : f32 to vector<8x12xf32>
    %70 = arith.select %67, %68, %69 : vector<8x12xi1>, vector<8x12xf32>
    %71 = vector.extract_strided_slice %52 {offsets = [0, 0], sizes = [8, 16], strides = [1, 1]} : vector<8x32xf32> to vector<8x16xf32>
    %72 = arith.truncf %71 : vector<8x16xf32> to vector<8x16xbf16>
    %73 = vector.extract_strided_slice %56 {offsets = [0, 0], sizes = [12, 16], strides = [1, 1]} : vector<12x32xbf16> to vector<12x16xbf16>
    %cst_27 = arith.constant dense<0.000000e+00> : vector<8x12xf32>
    %74 = tpu.matmul %72, %73, %cst_27 {dimension_numbers = #tpu.dot_dimension_numbers<[1], [1], [0], [0], [0, 0, 1, 0], [], []>} : vector<8x16xbf16>, vector<12x16xbf16>, vector<8x12xf32> -> vector<8x12xf32>
    %cst_28 = arith.constant 2.500000e-01 : f32
    %75 = vector.broadcast %cst_28 : f32 to vector<8x12xf32>
    %76 = arith.mulf %74, %75 : vector<8x12xf32>
    %77 = arith.addf %76, %70 : vector<8x12xf32>
    %cst_29 = arith.constant dense<0xFF800000> : vector<8xf32>
    %78 = vector.multi_reduction <maximumf>, %77, %cst_29 [1] : vector<8x12xf32> to vector<8xf32>
    %79 = vector.shape_cast %78 : vector<8xf32> to vector<8x1xf32>
    %80 = vector.broadcast %79 : vector<8x1xf32> to vector<8x12xf32>
    %81 = arith.subf %77, %80 : vector<8x12xf32>
    %82 = math.exp %81 : vector<8x12xf32>
    %cst_30 = arith.constant dense<0.000000e+00> : vector<8xf32>
    %83 = vector.multi_reduction <add>, %82, %cst_30 [1] : vector<8x12xf32> to vector<8xf32>
    %84 = vector.shape_cast %83 : vector<8xf32> to vector<8x1xf32>
    %85 = tpu.reciprocal %84 {approx = true} : vector<8x1xf32> -> vector<8x1xf32>
    %86 = vector.broadcast %85 : vector<8x1xf32> to vector<8x12xf32>
    %87 = arith.mulf %82, %86 : vector<8x12xf32>
    %88 = arith.truncf %87 : vector<8x12xf32> to vector<8x12xbf16>
    %89 = vector.extract_strided_slice %60 {offsets = [0, 0], sizes = [12, 16], strides = [1, 1]} : vector<12x32xbf16> to vector<12x16xbf16>
    %cst_31 = arith.constant dense<0.000000e+00> : vector<8x16xf32>
    %90 = tpu.matmul %88, %89, %cst_31 {dimension_numbers = #tpu.dot_dimension_numbers<[1], [0], [0], [1], [0, 0, 1, 1], [], []>} : vector<8x12xbf16>, vector<12x16xbf16>, vector<8x16xf32> -> vector<8x16xf32>
    %c0_32 = arith.constant 0 : index
    %c0_33 = arith.constant 0 : index
    %91 = vector.load %arg19[%c0_32, %c0_33] : memref<16x32xf32, #tpu.memory_space<vmem>>, vector<8x16xf32>
    tpu.vector_store %arg19[%c0_32, %c0_33], %90 {strides = array<i32>} : memref<16x32xf32, #tpu.memory_space<vmem>>, vector<8x16xf32>,
    %92 = vector.extract_strided_slice %52 {offsets = [0, 16], sizes = [8, 16], strides = [1, 1]} : vector<8x32xf32> to vector<8x16xf32>
    %93 = arith.truncf %92 : vector<8x16xf32> to vector<8x16xbf16>
    %94 = vector.extract_strided_slice %56 {offsets = [0, 16], sizes = [12, 16], strides = [1, 1]} : vector<12x32xbf16> to vector<12x16xbf16>
    %cst_34 = arith.constant dense<0.000000e+00> : vector<8x12xf32>
    %95 = tpu.matmul %93, %94, %cst_34 {dimension_numbers = #tpu.dot_dimension_numbers<[1], [1], [0], [0], [0, 0, 1, 0], [], []>} : vector<8x16xbf16>, vector<12x16xbf16>, vector<8x12xf32> -> vector<8x12xf32>
    %cst_35 = arith.constant 2.500000e-01 : f32
    %96 = vector.broadcast %cst_35 : f32 to vector<8x12xf32>
    %97 = arith.mulf %95, %96 : vector<8x12xf32>
    %98 = arith.addf %97, %70 : vector<8x12xf32>
    %cst_36 = arith.constant dense<0xFF800000> : vector<8xf32>
    %99 = vector.multi_reduction <maximumf>, %98, %cst_36 [1] : vector<8x12xf32> to vector<8xf32>
    %100 = vector.shape_cast %99 : vector<8xf32> to vector<8x1xf32>
    %101 = vector.broadcast %100 : vector<8x1xf32> to vector<8x12xf32>
    %102 = arith.subf %98, %101 : vector<8x12xf32>
    %103 = math.exp %102 : vector<8x12xf32>
    %cst_37 = arith.constant dense<0.000000e+00> : vector<8xf32>
    %104 = vector.multi_reduction <add>, %103, %cst_37 [1] : vector<8x12xf32> to vector<8xf32>
    %105 = vector.shape_cast %104 : vector<8xf32> to vector<8x1xf32>
    %106 = tpu.reciprocal %105 {approx = true} : vector<8x1xf32> -> vector<8x1xf32>
    %107 = vector.broadcast %106 : vector<8x1xf32> to vector<8x12xf32>
    %108 = arith.mulf %103, %107 : vector<8x12xf32>
    %109 = arith.truncf %108 : vector<8x12xf32> to vector<8x12xbf16>
    %110 = vector.extract_strided_slice %60 {offsets = [0, 16], sizes = [12, 16], strides = [1, 1]} : vector<12x32xbf16> to vector<12x16xbf16>
    %cst_38 = arith.constant dense<0.000000e+00> : vector<8x16xf32>
    %111 = tpu.matmul %109, %110, %cst_38 {dimension_numbers = #tpu.dot_dimension_numbers<[1], [0], [0], [1], [0, 0, 1, 1], [], []>} : vector<8x12xbf16>, vector<12x16xbf16>, vector<8x16xf32> -> vector<8x16xf32>
    %c0_39 = arith.constant 0 : index
    %c16 = arith.constant 16 : index
    %112 = vector.load %arg19[%c0_39, %c16] : memref<16x32xf32, #tpu.memory_space<vmem>>, vector<8x16xf32>
    tpu.vector_store %arg19[%c0_39, %c16], %111 {strides = array<i32>} : memref<16x32xf32, #tpu.memory_space<vmem>>, vector<8x16xf32>,
    %113 = vector.extract_strided_slice %41 {offsets = [8, 0], sizes = [8, 32], strides = [1, 1]} : vector<16x32xf32> to vector<8x32xf32>
    %114 = vector.extract_strided_slice %42 {offsets = [8, 0], sizes = [8, 32], strides = [1, 1]} : vector<16x32xf32> to vector<8x32xf32>
    %115 = vector.extract_strided_slice %44 {offsets = [4, 0], sizes = [4, 32], strides = [1, 1]} : vector<8x32xf32> to vector<4x32xf32>
    %116 = tpu.concatenate %114, %115 in 0 : vector<8x32xf32>, vector<4x32xf32> -> vector<12x32xf32>
    %117 = arith.truncf %116 : vector<12x32xf32> to vector<12x32xbf16>
    %118 = vector.extract_strided_slice %43 {offsets = [8, 0], sizes = [8, 32], strides = [1, 1]} : vector<16x32xf32> to vector<8x32xf32>
    %119 = vector.extract_strided_slice %45 {offsets = [4, 0], sizes = [4, 32], strides = [1, 1]} : vector<8x32xf32> to vector<4x32xf32>
    %120 = tpu.concatenate %118, %119 in 0 : vector<8x32xf32>, vector<4x32xf32> -> vector<12x32xf32>
    %121 = arith.truncf %120 : vector<12x32xf32> to vector<12x32xbf16>
    %122 = vector.extract_strided_slice %5 {offsets = [1, 0], sizes = [1, 8], strides = [1, 1]} : vector<2x8xf32> to vector<1x8xf32>
    %cst_40 = arith.constant 1.000000e+00 : f32
    %123 = vector.broadcast %cst_40 : f32 to vector<1x4xf32>
    %124 = tpu.concatenate %122, %123 in 1 : vector<1x8xf32>, vector<1x4xf32> -> vector<1x12xf32>
    %cst_41 = arith.constant 5.000000e-01 : f32
    %125 = vector.broadcast %cst_41 : f32 to vector<1x12xf32>
    %126 = arith.cmpf ogt, %124, %125 : vector<1x12xf32>
    %127 = vector.broadcast %126 : vector<1x12xi1> to vector<8x12xi1>
    %128 = arith.andi %51, %127 : vector<8x12xi1>
    %cst_42 = arith.constant 0.000000e+00 : f32
    %cst_43 = arith.constant -1.000000e+09 : f32
    %129 = vector.broadcast %cst_42 : f32 to vector<8x12xf32>
    %130 = vector.broadcast %cst_43 : f32 to vector<8x12xf32>
    %131 = arith.select %128, %129, %130 : vector<8x12xi1>, vector<8x12xf32>
    %132 = vector.extract_strided_slice %113 {offsets = [0, 0], sizes = [8, 16], strides = [1, 1]} : vector<8x32xf32> to vector<8x16xf32>
    %133 = arith.truncf %132 : vector<8x16xf32> to vector<8x16xbf16>
    %134 = vector.extract_strided_slice %117 {offsets = [0, 0], sizes = [12, 16], strides = [1, 1]} : vector<12x32xbf16> to vector<12x16xbf16>
    %cst_44 = arith.constant dense<0.000000e+00> : vector<8x12xf32>
    %135 = tpu.matmul %133, %134, %cst_44 {dimension_numbers = #tpu.dot_dimension_numbers<[1], [1], [0], [0], [0, 0, 1, 0], [], []>} : vector<8x16xbf16>, vector<12x16xbf16>, vector<8x12xf32> -> vector<8x12xf32>
    %cst_45 = arith.constant 2.500000e-01 : f32
    %136 = vector.broadcast %cst_45 : f32 to vector<8x12xf32>
    %137 = arith.mulf %135, %136 : vector<8x12xf32>
    %138 = arith.addf %137, %131 : vector<8x12xf32>
    %cst_46 = arith.constant dense<0xFF800000> : vector<8xf32>
    %139 = vector.multi_reduction <maximumf>, %138, %cst_46 [1] : vector<8x12xf32> to vector<8xf32>
    %140 = vector.shape_cast %139 : vector<8xf32> to vector<8x1xf32>
    %141 = vector.broadcast %140 : vector<8x1xf32> to vector<8x12xf32>
    %142 = arith.subf %138, %141 : vector<8x12xf32>
    %143 = math.exp %142 : vector<8x12xf32>
    %cst_47 = arith.constant dense<0.000000e+00> : vector<8xf32>
    %144 = vector.multi_reduction <add>, %143, %cst_47 [1] : vector<8x12xf32> to vector<8xf32>
    %145 = vector.shape_cast %144 : vector<8xf32> to vector<8x1xf32>
    %146 = tpu.reciprocal %145 {approx = true} : vector<8x1xf32> -> vector<8x1xf32>
    %147 = vector.broadcast %146 : vector<8x1xf32> to vector<8x12xf32>
    %148 = arith.mulf %143, %147 : vector<8x12xf32>
    %149 = arith.truncf %148 : vector<8x12xf32> to vector<8x12xbf16>
    %150 = vector.extract_strided_slice %121 {offsets = [0, 0], sizes = [12, 16], strides = [1, 1]} : vector<12x32xbf16> to vector<12x16xbf16>
    %cst_48 = arith.constant dense<0.000000e+00> : vector<8x16xf32>
    %151 = tpu.matmul %149, %150, %cst_48 {dimension_numbers = #tpu.dot_dimension_numbers<[1], [0], [0], [1], [0, 0, 1, 1], [], []>} : vector<8x12xbf16>, vector<12x16xbf16>, vector<8x16xf32> -> vector<8x16xf32>
    %c8 = arith.constant 8 : index
    %c0_49 = arith.constant 0 : index
    %152 = vector.load %arg19[%c8, %c0_49] : memref<16x32xf32, #tpu.memory_space<vmem>>, vector<8x16xf32>
    tpu.vector_store %arg19[%c8, %c0_49], %151 {strides = array<i32>} : memref<16x32xf32, #tpu.memory_space<vmem>>, vector<8x16xf32>,
    %153 = vector.extract_strided_slice %113 {offsets = [0, 16], sizes = [8, 16], strides = [1, 1]} : vector<8x32xf32> to vector<8x16xf32>
    %154 = arith.truncf %153 : vector<8x16xf32> to vector<8x16xbf16>
    %155 = vector.extract_strided_slice %117 {offsets = [0, 16], sizes = [12, 16], strides = [1, 1]} : vector<12x32xbf16> to vector<12x16xbf16>
    %cst_50 = arith.constant dense<0.000000e+00> : vector<8x12xf32>
    %156 = tpu.matmul %154, %155, %cst_50 {dimension_numbers = #tpu.dot_dimension_numbers<[1], [1], [0], [0], [0, 0, 1, 0], [], []>} : vector<8x16xbf16>, vector<12x16xbf16>, vector<8x12xf32> -> vector<8x12xf32>
    %cst_51 = arith.constant 2.500000e-01 : f32
    %157 = vector.broadcast %cst_51 : f32 to vector<8x12xf32>
    %158 = arith.mulf %156, %157 : vector<8x12xf32>
    %159 = arith.addf %158, %131 : vector<8x12xf32>
    %cst_52 = arith.constant dense<0xFF800000> : vector<8xf32>
    %160 = vector.multi_reduction <maximumf>, %159, %cst_52 [1] : vector<8x12xf32> to vector<8xf32>
    %161 = vector.shape_cast %160 : vector<8xf32> to vector<8x1xf32>
    %162 = vector.broadcast %161 : vector<8x1xf32> to vector<8x12xf32>
    %163 = arith.subf %159, %162 : vector<8x12xf32>
    %164 = math.exp %163 : vector<8x12xf32>
    %cst_53 = arith.constant dense<0.000000e+00> : vector<8xf32>
    %165 = vector.multi_reduction <add>, %164, %cst_53 [1] : vector<8x12xf32> to vector<8xf32>
    %166 = vector.shape_cast %165 : vector<8xf32> to vector<8x1xf32>
    %167 = tpu.reciprocal %166 {approx = true} : vector<8x1xf32> -> vector<8x1xf32>
    %168 = vector.broadcast %167 : vector<8x1xf32> to vector<8x12xf32>
    %169 = arith.mulf %164, %168 : vector<8x12xf32>
    %170 = arith.truncf %169 : vector<8x12xf32> to vector<8x12xbf16>
    %171 = vector.extract_strided_slice %121 {offsets = [0, 16], sizes = [12, 16], strides = [1, 1]} : vector<12x32xbf16> to vector<12x16xbf16>
    %cst_54 = arith.constant dense<0.000000e+00> : vector<8x16xf32>
    %172 = tpu.matmul %170, %171, %cst_54 {dimension_numbers = #tpu.dot_dimension_numbers<[1], [0], [0], [1], [0, 0, 1, 1], [], []>} : vector<8x12xbf16>, vector<12x16xbf16>, vector<8x16xf32> -> vector<8x16xf32>
    %c8_55 = arith.constant 8 : index
    %c16_56 = arith.constant 16 : index
    %173 = vector.load %arg19[%c8_55, %c16_56] : memref<16x32xf32, #tpu.memory_space<vmem>>, vector<8x16xf32>
    tpu.vector_store %arg19[%c8_55, %c16_56], %172 {strides = array<i32>} : memref<16x32xf32, #tpu.memory_space<vmem>>, vector<8x16xf32>,
    %c0_57 = arith.constant 0 : index
    %c0_58 = arith.constant 0 : index
    %174 = vector.load %arg19[%c0_57, %c0_58] : memref<16x32xf32, #tpu.memory_space<vmem>>, vector<16x32xf32>
    %175 = arith.truncf %174 : vector<16x32xf32> to vector<16x32xbf16>
    %c0_59 = arith.constant 0 : index
    %c0_60 = arith.constant 0 : index
    %c0_61 = arith.constant 0 : index
    %176 = vector.load %arg9[%c0_59, %c0_60, %c0_61] : memref<1x32x32xbf16, #tpu.memory_space<vmem>>, vector<1x32x32xbf16>
    %177 = vector.shape_cast %176 : vector<1x32x32xbf16> to vector<32x32xbf16>
    %cst_62 = arith.constant dense<0.000000e+00> : vector<16x32xf32>
    %178 = tpu.matmul %175, %177, %cst_62 {dimension_numbers = #tpu.dot_dimension_numbers<[1], [0], [0], [1], [0, 0, 1, 1], [], []>} : vector<16x32xbf16>, vector<32x32xbf16>, vector<16x32xf32> -> vector<16x32xf32>
    %c0_63 = arith.constant 0 : index
    %c0_64 = arith.constant 0 : index
    %c0_65 = arith.constant 0 : index
    %179 = vector.load %arg10[%c0_63, %c0_64, %c0_65] : memref<1x1x32xf32, #tpu.memory_space<vmem>>, vector<1x1x32xf32>
    %180 = vector.shape_cast %179 : vector<1x1x32xf32> to vector<1x32xf32>
    %181 = vector.broadcast %180 : vector<1x32xf32> to vector<16x32xf32>
    %182 = arith.addf %178, %181 : vector<16x32xf32>
    %183 = arith.addf %3, %182 : vector<16x32xf32>
    %c0_66 = arith.constant 0 : index
    %c0_67 = arith.constant 0 : index
    %c0_68 = arith.constant 0 : index
    %184 = vector.load %arg11[%c0_66, %c0_67, %c0_68] : memref<1x1x32xf32, #tpu.memory_space<vmem>>, vector<1x1x32xf32>
    %185 = vector.shape_cast %184 : vector<1x1x32xf32> to vector<1x32xf32>
    %c0_69 = arith.constant 0 : index
    %c0_70 = arith.constant 0 : index
    %c0_71 = arith.constant 0 : index
    %186 = vector.load %arg12[%c0_69, %c0_70, %c0_71] : memref<1x1x32xf32, #tpu.memory_space<vmem>>, vector<1x1x32xf32>
    %187 = vector.shape_cast %186 : vector<1x1x32xf32> to vector<1x32xf32>
    %cst_72 = arith.constant dense<0.000000e+00> : vector<16xf32>
    %188 = vector.multi_reduction <add>, %183, %cst_72 [1] : vector<16x32xf32> to vector<16xf32>
    %189 = vector.shape_cast %188 : vector<16xf32> to vector<16x1xf32>
    %cst_73 = arith.constant 3.200000e+01 : f32
    %190 = vector.broadcast %cst_73 : f32 to vector<16x1xf32>
    %191 = arith.divf %189, %190 : vector<16x1xf32>
    %192 = vector.broadcast %191 : vector<16x1xf32> to vector<16x32xf32>
    %193 = arith.subf %183, %192 : vector<16x32xf32>
    %194 = arith.mulf %193, %193 : vector<16x32xf32>
    %cst_74 = arith.constant dense<0.000000e+00> : vector<16xf32>
    %195 = vector.multi_reduction <add>, %194, %cst_74 [1] : vector<16x32xf32> to vector<16xf32>
    %196 = vector.shape_cast %195 : vector<16xf32> to vector<16x1xf32>
    %cst_75 = arith.constant 3.200000e+01 : f32
    %197 = vector.broadcast %cst_75 : f32 to vector<16x1xf32>
    %198 = arith.divf %196, %197 : vector<16x1xf32>
    %199 = vector.broadcast %191 : vector<16x1xf32> to vector<16x32xf32>
    %200 = arith.subf %183, %199 : vector<16x32xf32>
    %cst_76 = arith.constant 9.99999974E-6 : f32
    %201 = vector.broadcast %cst_76 : f32 to vector<16x1xf32>
    %202 = arith.addf %198, %201 : vector<16x1xf32>
    %203 = math.rsqrt %202 : vector<16x1xf32>
    %204 = vector.broadcast %203 : vector<16x1xf32> to vector<16x32xf32>
    %205 = arith.mulf %200, %204 : vector<16x32xf32>
    %206 = vector.broadcast %185 : vector<1x32xf32> to vector<16x32xf32>
    %207 = arith.mulf %205, %206 : vector<16x32xf32>
    %208 = vector.broadcast %187 : vector<1x32xf32> to vector<16x32xf32>
    %209 = arith.addf %207, %208 : vector<16x32xf32>
    %210 = arith.truncf %209 : vector<16x32xf32> to vector<16x32xbf16>
    %c0_77 = arith.constant 0 : index
    %c0_78 = arith.constant 0 : index
    %c0_79 = arith.constant 0 : index
    %211 = vector.load %arg13[%c0_77, %c0_78, %c0_79] : memref<1x32x128xbf16, #tpu.memory_space<vmem>>, vector<1x32x128xbf16>
    %212 = vector.shape_cast %211 : vector<1x32x128xbf16> to vector<32x128xbf16>
    %cst_80 = arith.constant dense<0.000000e+00> : vector<16x128xf32>
    %213 = tpu.matmul %210, %212, %cst_80 {dimension_numbers = #tpu.dot_dimension_numbers<[1], [0], [0], [1], [0, 0, 1, 1], [], []>} : vector<16x32xbf16>, vector<32x128xbf16>, vector<16x128xf32> -> vector<16x128xf32>
    %c0_81 = arith.constant 0 : index
    %c0_82 = arith.constant 0 : index
    %c0_83 = arith.constant 0 : index
    %214 = vector.load %arg14[%c0_81, %c0_82, %c0_83] : memref<1x1x128xf32, #tpu.memory_space<vmem>>, vector<1x1x128xf32>
    %215 = vector.shape_cast %214 : vector<1x1x128xf32> to vector<1x128xf32>
    %216 = vector.broadcast %215 : vector<1x128xf32> to vector<16x128xf32>
    %217 = arith.addf %213, %216 : vector<16x128xf32>
    %218 = arith.mulf %217, %217 : vector<16x128xf32>
    %219 = arith.mulf %217, %218 : vector<16x128xf32>
    %cst_84 = arith.constant 4.471500e-02 : f32
    %220 = vector.broadcast %cst_84 : f32 to vector<16x128xf32>
    %221 = arith.mulf %220, %219 : vector<16x128xf32>
    %222 = arith.addf %217, %221 : vector<16x128xf32>
    %cst_85 = arith.constant 0.797884583 : f32
    %223 = vector.broadcast %cst_85 : f32 to vector<16x128xf32>
    %224 = arith.mulf %223, %222 : vector<16x128xf32>
    %225 = math.tanh %224 : vector<16x128xf32>
    %cst_86 = arith.constant 1.000000e+00 : f32
    %226 = vector.broadcast %cst_86 : f32 to vector<16x128xf32>
    %227 = arith.addf %226, %225 : vector<16x128xf32>
    %cst_87 = arith.constant 5.000000e-01 : f32
    %228 = vector.broadcast %cst_87 : f32 to vector<16x128xf32>
    %229 = arith.mulf %228, %227 : vector<16x128xf32>
    %230 = arith.mulf %217, %229 : vector<16x128xf32>
    %231 = arith.truncf %230 : vector<16x128xf32> to vector<16x128xbf16>
    %c0_88 = arith.constant 0 : index
    %c0_89 = arith.constant 0 : index
    %c0_90 = arith.constant 0 : index
    %232 = vector.load %arg15[%c0_88, %c0_89, %c0_90] : memref<1x128x32xbf16, #tpu.memory_space<vmem>>, vector<1x128x32xbf16>
    %233 = vector.shape_cast %232 : vector<1x128x32xbf16> to vector<128x32xbf16>
    %cst_91 = arith.constant dense<0.000000e+00> : vector<16x32xf32>
    %234 = tpu.matmul %231, %233, %cst_91 {dimension_numbers = #tpu.dot_dimension_numbers<[1], [0], [0], [1], [0, 0, 1, 1], [], []>} : vector<16x128xbf16>, vector<128x32xbf16>, vector<16x32xf32> -> vector<16x32xf32>
    %c0_92 = arith.constant 0 : index
    %c0_93 = arith.constant 0 : index
    %c0_94 = arith.constant 0 : index
    %235 = vector.load %arg16[%c0_92, %c0_93, %c0_94] : memref<1x1x32xf32, #tpu.memory_space<vmem>>, vector<1x1x32xf32>
    %236 = vector.shape_cast %235 : vector<1x1x32xf32> to vector<1x32xf32>
    %237 = vector.broadcast %236 : vector<1x32xf32> to vector<16x32xf32>
    %238 = arith.addf %234, %237 : vector<16x32xf32>
    %239 = arith.addf %183, %238 : vector<16x32xf32>
    %c0_95 = arith.constant 0 : index
    %c0_96 = arith.constant 0 : index
    %240 = vector.load %arg17[%c0_95, %c0_96] : memref<16x32xf32, #tpu.memory_space<vmem>>, vector<16x32xf32>
    tpu.vector_store %arg17[%c0_95, %c0_96], %239 {strides = array<i32>} : memref<16x32xf32, #tpu.memory_space<vmem>>, vector<16x32xf32>,
    return
  }
  func.func @transform_0(%arg0: i32) -> (i32, i32) {
    %c0_i32 = arith.constant 0 : i32
    %c0_i32_0 = arith.constant 0 : i32
    %c0_i32_1 = arith.constant 0 : i32
    return %c0_i32, %c0_i32_0 : i32, i32
  }
  func.func @transform_1(%arg0: i32) -> (i32, i32) {
    %c0_i32 = arith.constant 0 : i32
    %c0_i32_0 = arith.constant 0 : i32
    %c0_i32_1 = arith.constant 0 : i32
    return %c0_i32, %c0_i32_0 : i32, i32
  }
  func.func @transform_2(%arg0: i32) -> (i32, i32) {
    %c0_i32 = arith.constant 0 : i32
    %c0_i32_0 = arith.constant 0 : i32
    %c0_i32_1 = arith.constant 0 : i32
    return %c0_i32, %c0_i32_0 : i32, i32
  }
  func.func @transform_3(%arg0: i32) -> (i32, i32) {
    %c0_i32 = arith.constant 0 : i32
    %c0_i32_0 = arith.constant 0 : i32
    %c0_i32_1 = arith.constant 0 : i32
    return %c0_i32, %c0_i32_0 : i32, i32
  }
  func.func @transform_4(%arg0: i32) -> (i32, i32, i32) {
    %c0_i32 = arith.constant 0 : i32
    %c0_i32_0 = arith.constant 0 : i32
    %c0_i32_1 = arith.constant 0 : i32
    return %arg0, %c0_i32, %c0_i32_0 : i32, i32, i32
  }
  func.func @transform_5(%arg0: i32) -> (i32, i32, i32) {
    %c0_i32 = arith.constant 0 : i32
    %c0_i32_0 = arith.constant 0 : i32
    %c0_i32_1 = arith.constant 0 : i32
    return %arg0, %c0_i32, %c0_i32_0 : i32, i32, i32
  }
  func.func @transform_6(%arg0: i32) -> (i32, i32, i32) {
    %c0_i32 = arith.constant 0 : i32
    %c0_i32_0 = arith.constant 0 : i32
    %c0_i32_1 = arith.constant 0 : i32
    return %arg0, %c0_i32, %c0_i32_0 : i32, i32, i32
  }
  func.func @transform_7(%arg0: i32) -> (i32, i32, i32) {
    %c0_i32 = arith.constant 0 : i32
    %c0_i32_0 = arith.constant 0 : i32
    %c0_i32_1 = arith.constant 0 : i32
    return %arg0, %c0_i32, %c0_i32_0 : i32, i32, i32
  }
  func.func @transform_8(%arg0: i32) -> (i32, i32, i32) {
    %c0_i32 = arith.constant 0 : i32
    %c0_i32_0 = arith.constant 0 : i32
    %c0_i32_1 = arith.constant 0 : i32
    return %arg0, %c0_i32, %c0_i32_0 : i32, i32, i32
  }
  func.func @transform_9(%arg0: i32) -> (i32, i32, i32) {
    %c0_i32 = arith.constant 0 : i32
    %c0_i32_0 = arith.constant 0 : i32
    %c0_i32_1 = arith.constant 0 : i32
    return %arg0, %c0_i32, %c0_i32_0 : i32, i32, i32
  }
  func.func @transform_10(%arg0: i32) -> (i32, i32, i32) {
    %c0_i32 = arith.constant 0 : i32
    %c0_i32_0 = arith.constant 0 : i32
    %c0_i32_1 = arith.constant 0 : i32
    return %arg0, %c0_i32, %c0_i32_0 : i32, i32, i32
  }
  func.func @transform_11(%arg0: i32) -> (i32, i32, i32) {
    %c0_i32 = arith.constant 0 : i32
    %c0_i32_0 = arith.constant 0 : i32
    %c0_i32_1 = arith.constant 0 : i32
    return %arg0, %c0_i32, %c0_i32_0 : i32, i32, i32
  }
  func.func @transform_12(%arg0: i32) -> (i32, i32, i32) {
    %c0_i32 = arith.constant 0 : i32
    %c0_i32_0 = arith.constant 0 : i32
    %c0_i32_1 = arith.constant 0 : i32
    return %arg0, %c0_i32, %c0_i32_0 : i32, i32, i32
  }
  func.func @transform_13(%arg0: i32) -> (i32, i32, i32) {
    %c0_i32 = arith.constant 0 : i32
    %c0_i32_0 = arith.constant 0 : i32
    %c0_i32_1 = arith.constant 0 : i32
    return %arg0, %c0_i32, %c0_i32_0 : i32, i32, i32
  }
  func.func @transform_14(%arg0: i32) -> (i32, i32, i32) {
    %c0_i32 = arith.constant 0 : i32
    %c0_i32_0 = arith.constant 0 : i32
    %c0_i32_1 = arith.constant 0 : i32
    return %arg0, %c0_i32, %c0_i32_0 : i32, i32, i32
  }
  func.func @transform_15(%arg0: i32) -> (i32, i32, i32) {
    %c0_i32 = arith.constant 0 : i32
    %c0_i32_0 = arith.constant 0 : i32
    %c0_i32_1 = arith.constant 0 : i32
    return %arg0, %c0_i32, %c0_i32_0 : i32, i32, i32
  }
  func.func @transform_16(%arg0: i32) -> (i32, i32) {
    %c0_i32 = arith.constant 0 : i32
    %c0_i32_0 = arith.constant 0 : i32
    %c0_i32_1 = arith.constant 0 : i32
    return %c0_i32, %c0_i32_0 : i32, i32
  }
}

module attributes {stable_mosaic.version = 11 : i64} {
  func.func @_head_kernel(%arg0: i32, %arg1: memref<16x32xf32, #tpu.memory_space<vmem>>, %arg2: memref<1x32xf32, #tpu.memory_space<vmem>>, %arg3: memref<1x32xf32, #tpu.memory_space<vmem>>, %arg4: memref<32x128xbf16, #tpu.memory_space<vmem>>, %arg5: memref<16x1xi32, #tpu.memory_space<vmem>>, %arg6: memref<16x128xf32, #tpu.memory_space<vmem>>, %arg7: memref<16x1xi32, #tpu.memory_space<vmem>>, %arg8: memref<1x1xf32, #tpu.memory_space<vmem>>) attributes {dimension_semantics = [#tpu.dimension_semantics<arbitrary>], iteration_bounds = array<i64: 1>, scalar_prefetch = 0 : i64, scratch_operands = 0 : i64, tpu.core_type = #tpu.core_type<tc>, window_params = [{pipeline_mode = #tpu.pipeline_mode<synchronous>, transform_indices = @transform_0, window_bounds = array<i64: 16, 32>}, {pipeline_mode = #tpu.pipeline_mode<synchronous>, transform_indices = @transform_1, window_bounds = array<i64: 1, 32>}, {pipeline_mode = #tpu.pipeline_mode<synchronous>, transform_indices = @transform_2, window_bounds = array<i64: 1, 32>}, {pipeline_mode = #tpu.pipeline_mode<synchronous>, transform_indices = @transform_3, window_bounds = array<i64: 32, 128>}, {pipeline_mode = #tpu.pipeline_mode<synchronous>, transform_indices = @transform_4, window_bounds = array<i64: 16, 1>}, {pipeline_mode = #tpu.pipeline_mode<synchronous>, transform_indices = @transform_5, window_bounds = array<i64: 16, 128>}, {pipeline_mode = #tpu.pipeline_mode<synchronous>, transform_indices = @transform_6, window_bounds = array<i64: 16, 1>}, {pipeline_mode = #tpu.pipeline_mode<synchronous>, transform_indices = @transform_7, window_bounds = array<i64: 1, 1>}]} {
    %c0 = arith.constant 0 : index
    %c0_0 = arith.constant 0 : index
    %0 = vector.load %arg1[%c0, %c0_0] : memref<16x32xf32, #tpu.memory_space<vmem>>, vector<16x32xf32>
    %cst = arith.constant dense<0.000000e+00> : vector<16xf32>
    %1 = vector.multi_reduction <add>, %0, %cst [1] : vector<16x32xf32> to vector<16xf32>
    %2 = vector.shape_cast %1 : vector<16xf32> to vector<16x1xf32>
    %cst_1 = arith.constant 3.200000e+01 : f32
    %3 = vector.broadcast %cst_1 : f32 to vector<16x1xf32>
    %4 = arith.divf %2, %3 : vector<16x1xf32>
    %5 = vector.broadcast %4 : vector<16x1xf32> to vector<16x32xf32>
    %6 = arith.subf %0, %5 : vector<16x32xf32>
    %7 = arith.mulf %6, %6 : vector<16x32xf32>
    %cst_2 = arith.constant dense<0.000000e+00> : vector<16xf32>
    %8 = vector.multi_reduction <add>, %7, %cst_2 [1] : vector<16x32xf32> to vector<16xf32>
    %9 = vector.shape_cast %8 : vector<16xf32> to vector<16x1xf32>
    %cst_3 = arith.constant 3.200000e+01 : f32
    %10 = vector.broadcast %cst_3 : f32 to vector<16x1xf32>
    %11 = arith.divf %9, %10 : vector<16x1xf32>
    %12 = vector.broadcast %4 : vector<16x1xf32> to vector<16x32xf32>
    %13 = arith.subf %0, %12 : vector<16x32xf32>
    %cst_4 = arith.constant 9.99999974E-6 : f32
    %14 = vector.broadcast %cst_4 : f32 to vector<16x1xf32>
    %15 = arith.addf %11, %14 : vector<16x1xf32>
    %16 = math.rsqrt %15 : vector<16x1xf32>
    %17 = vector.broadcast %16 : vector<16x1xf32> to vector<16x32xf32>
    %18 = arith.mulf %13, %17 : vector<16x32xf32>
    %c0_5 = arith.constant 0 : index
    %c0_6 = arith.constant 0 : index
    %19 = vector.load %arg2[%c0_5, %c0_6] : memref<1x32xf32, #tpu.memory_space<vmem>>, vector<1x32xf32>
    %20 = vector.broadcast %19 : vector<1x32xf32> to vector<16x32xf32>
    %21 = arith.mulf %18, %20 : vector<16x32xf32>
    %c0_7 = arith.constant 0 : index
    %c0_8 = arith.constant 0 : index
    %22 = vector.load %arg3[%c0_7, %c0_8] : memref<1x32xf32, #tpu.memory_space<vmem>>, vector<1x32xf32>
    %23 = vector.broadcast %22 : vector<1x32xf32> to vector<16x32xf32>
    %24 = arith.addf %21, %23 : vector<16x32xf32>
    %25 = arith.truncf %24 : vector<16x32xf32> to vector<16x32xbf16>
    %c0_9 = arith.constant 0 : index
    %c0_10 = arith.constant 0 : index
    %26 = vector.load %arg4[%c0_9, %c0_10] : memref<32x128xbf16, #tpu.memory_space<vmem>>, vector<32x128xbf16>
    %cst_11 = arith.constant dense<0.000000e+00> : vector<16x128xf32>
    %27 = tpu.matmul %25, %26, %cst_11 {dimension_numbers = #tpu.dot_dimension_numbers<[1], [0], [0], [1], [0, 0, 1, 1], [], []>} : vector<16x32xbf16>, vector<32x128xbf16>, vector<16x128xf32> -> vector<16x128xf32>
    %c0_12 = arith.constant 0 : index
    %c0_13 = arith.constant 0 : index
    %28 = vector.load %arg6[%c0_12, %c0_13] : memref<16x128xf32, #tpu.memory_space<vmem>>, vector<16x128xf32>
    tpu.vector_store %arg6[%c0_12, %c0_13], %27 {strides = array<i32>} : memref<16x128xf32, #tpu.memory_space<vmem>>, vector<16x128xf32>,
    %cst_14 = arith.constant dense<0xFF800000> : vector<16xf32>
    %29 = vector.multi_reduction <maximumf>, %27, %cst_14 [1] : vector<16x128xf32> to vector<16xf32>
    %30 = vector.shape_cast %29 : vector<16xf32> to vector<16x1xf32>
    %31 = tpu.iota {dimensions = array<i32: 1>} : vector<16x128xi32>
    %32 = vector.broadcast %30 : vector<16x1xf32> to vector<16x128xf32>
    %33 = arith.cmpf oeq, %27, %32 : vector<16x128xf32>
    %c128_i32 = arith.constant 128 : i32
    %34 = vector.broadcast %c128_i32 : i32 to vector<16x128xi32>
    %35 = arith.select %33, %31, %34 : vector<16x128xi1>, vector<16x128xi32>
    %cst_15 = arith.constant dense<2147483647> : vector<16xi32>
    %36 = vector.multi_reduction <minsi>, %35, %cst_15 [1] : vector<16x128xi32> to vector<16xi32>
    %37 = vector.shape_cast %36 : vector<16xi32> to vector<16x1xi32>
    %c0_16 = arith.constant 0 : index
    %c0_17 = arith.constant 0 : index
    %38 = vector.load %arg7[%c0_16, %c0_17] : memref<16x1xi32, #tpu.memory_space<vmem>>, vector<16x1xi32>
    tpu.vector_store %arg7[%c0_16, %c0_17], %37 {strides = array<i32>} : memref<16x1xi32, #tpu.memory_space<vmem>>, vector<16x1xi32>,
    %c0_18 = arith.constant 0 : index
    %c0_19 = arith.constant 0 : index
    %39 = vector.load %arg5[%c0_18, %c0_19] : memref<16x1xi32, #tpu.memory_space<vmem>>, vector<16x1xi32>
    %40 = vector.broadcast %30 : vector<16x1xf32> to vector<16x128xf32>
    %41 = arith.subf %27, %40 : vector<16x128xf32>
    %42 = math.exp %41 : vector<16x128xf32>
    %cst_20 = arith.constant dense<0.000000e+00> : vector<16xf32>
    %43 = vector.multi_reduction <add>, %42, %cst_20 [1] : vector<16x128xf32> to vector<16xf32>
    %44 = vector.shape_cast %43 : vector<16xf32> to vector<16x1xf32>
    %45 = math.log %44 : vector<16x1xf32>
    %46 = arith.addf %45, %30 : vector<16x1xf32>
    %47 = vector.broadcast %39 : vector<16x1xi32> to vector<16x128xi32>
    %48 = arith.cmpi eq, %31, %47 : vector<16x128xi32>
    %cst_21 = arith.constant 0.000000e+00 : f32
    %49 = vector.broadcast %cst_21 : f32 to vector<16x128xf32>
    %50 = arith.select %48, %27, %49 : vector<16x128xi1>, vector<16x128xf32>
    %cst_22 = arith.constant dense<0.000000e+00> : vector<16xf32>
    %51 = vector.multi_reduction <add>, %50, %cst_22 [1] : vector<16x128xf32> to vector<16xf32>
    %52 = vector.shape_cast %51 : vector<16xf32> to vector<16x1xf32>
    %c0_i32 = arith.constant 0 : i32
    %53 = vector.broadcast %c0_i32 : i32 to vector<16x1xi32>
    %54 = arith.cmpi ne, %39, %53 : vector<16x1xi32>
    %55 = arith.extui %54 : vector<16x1xi1> to vector<16x1xi32>
    %56 = arith.sitofp %55 : vector<16x1xi32> to vector<16x1xf32>
    %57 = arith.subf %46, %52 : vector<16x1xf32>
    %58 = arith.mulf %57, %56 : vector<16x1xf32>
    %59 = vector.shape_cast %58 : vector<16x1xf32> to vector<1x16x1xf32>
    %cst_23 = arith.constant dense<0.000000e+00> : vector<1xf32>
    %60 = vector.multi_reduction <add>, %59, %cst_23 [1, 2] : vector<1x16x1xf32> to vector<1xf32>
    %61 = vector.shape_cast %60 : vector<1xf32> to vector<1x1x1xf32>
    %62 = vector.extract %61[0, 0, 0] : f32 from vector<1x1x1xf32>
    %63 = vector.broadcast %62 : f32 to vector<1x1xf32>
    %c0_24 = arith.constant 0 : index
    %c0_25 = arith.constant 0 : index
    %64 = vector.load %arg8[%c0_24, %c0_25] : memref<1x1xf32, #tpu.memory_space<vmem>>, vector<1x1xf32>
    tpu.vector_store %arg8[%c0_24, %c0_25], %63 {strides = array<i32>} : memref<1x1xf32, #tpu.memory_space<vmem>>, vector<1x1xf32>,
    return
  }
  func.func @transform_0(%arg0: i32) -> (i32, i32) {
    %c0_i32 = arith.constant 0 : i32
    %c0_i32_0 = arith.constant 0 : i32
    %c0_i32_1 = arith.constant 0 : i32
    return %c0_i32, %c0_i32_0 : i32, i32
  }
  func.func @transform_1(%arg0: i32) -> (i32, i32) {
    %c0_i32 = arith.constant 0 : i32
    %c0_i32_0 = arith.constant 0 : i32
    %c0_i32_1 = arith.constant 0 : i32
    return %c0_i32, %c0_i32_0 : i32, i32
  }
  func.func @transform_2(%arg0: i32) -> (i32, i32) {
    %c0_i32 = arith.constant 0 : i32
    %c0_i32_0 = arith.constant 0 : i32
    %c0_i32_1 = arith.constant 0 : i32
    return %c0_i32, %c0_i32_0 : i32, i32
  }
  func.func @transform_3(%arg0: i32) -> (i32, i32) {
    %c0_i32 = arith.constant 0 : i32
    %c0_i32_0 = arith.constant 0 : i32
    %c0_i32_1 = arith.constant 0 : i32
    return %c0_i32, %c0_i32_0 : i32, i32
  }
  func.func @transform_4(%arg0: i32) -> (i32, i32) {
    %c0_i32 = arith.constant 0 : i32
    %c0_i32_0 = arith.constant 0 : i32
    %c0_i32_1 = arith.constant 0 : i32
    return %c0_i32, %c0_i32_0 : i32, i32
  }
  func.func @transform_5(%arg0: i32) -> (i32, i32) {
    %c0_i32 = arith.constant 0 : i32
    %c0_i32_0 = arith.constant 0 : i32
    %c0_i32_1 = arith.constant 0 : i32
    return %c0_i32, %c0_i32_0 : i32, i32
  }
  func.func @transform_6(%arg0: i32) -> (i32, i32) {
    %c0_i32 = arith.constant 0 : i32
    %c0_i32_0 = arith.constant 0 : i32
    %c0_i32_1 = arith.constant 0 : i32
    return %c0_i32, %c0_i32_0 : i32, i32
  }
  func.func @transform_7(%arg0: i32) -> (i32, i32) {
    %c0_i32 = arith.constant 0 : i32
    %c0_i32_0 = arith.constant 0 : i32
    %c0_i32_1 = arith.constant 0 : i32
    return %c0_i32, %c0_i32_0 : i32, i32
  }
}

</mosaic_0001>

<bundles_post_ra>
// kernel: new_gpt_forward.3
= control target key start
LH: loop header
LB: loop body
LE: loop exit
PB: predicated region body
PF: predicated region fallthrough
CT: control target
= control target key end

     0   :  { %13 = vsyncpa [#allocation3], 0  ;;  %vm28_vm0 = vcmask 261120   ;;  %s475_s0 = inlined_call_operand.vmem [shape: f32[16,32], index: 0, kind: input, shape index: {}]   ;;  %s476_s1 = inlined_call_operand.vmem [shape: f32[1,32], index: 1, kind: input, shape index: {}]   ;;  %s477_s2 = inlined_call_operand.vmem [shape: f32[1,32], index: 2, kind: input, shape index: {}]   ;;  %s478_s3 = inlined_call_operand.vmem [shape: bf16[32,128], index: 3, kind: input, shape index: {}]   ;;  %s479_s4 = inlined_call_operand.vmem [shape: s32[16,1], index: 4, kind: input, shape index: {}]   ;;  %s480_s5 = inlined_call_operand.hbm [shape: f32[16,128], index: 5, kind: output, shape index: {0}]   ;;  %s481_s6 = inlined_call_operand.vmem [shape: s32[16,1], index: 6, kind: output, shape index: {1}]   ;;  %s482_s7 = inlined_call_operand.hbm [shape: f32[1,1], index: 7, kind: output, shape index: {2}]  }
   0x1   :  { %v26_v0 = vld [vmem:[%s475_s0] sm:$0xff]  ;;  %v27_v1 = vld [vmem:[%s475_s0 + $0x8] sm:$0xff] }
   0x2   :  { %v29_v2 = vsel %vm28_vm0, %v26_v0, 0.0 }
   0x3   :  { %30 = vadd.xlane.f32.xlu0 %v29_v2 }
   0x4   :  { %14 = vsyncpa [#allocation5], 0  ;;  %v32_v3 = vsel %vm28_vm0, %v27_v1, 0.0  ;;  %v298_v14 = vld [vmem:[%s478_s3] sm:$0xff]   ;;  %v360_v15 = vmov 0.0   ;;  %v299_v16 = vld [vmem:[%s478_s3 + $0x8] sm:$0xff]   ;;  %v141_v47 = vlaneseq }
   0x5   :  { %279 = vmatprep.subr.bf16.mxu0 %v360_v15  ;;  %vm361_vm1 = vmmov 0   ;;  %v269_v25 = vld [vmem:[%s476_s1] ss:$0 sm:$0xff]  ;;  %v362_v34 = vmov 0   ;;  %v179_v39 = vld [vmem:[%s479_s4 + $0x8] sm:$0xff]  ;;  %vm175_vm9 = vcmask 7168  }
   0x6   :  { %280 = vmatpush3.bf16.msra.mxu0 %v298_v14  ;;  %283 = vmatprep.mubr.msk.bf16.mxu0 %vm361_vm1, %v360_v15  ;;  %v270_v29 = vld [vmem:[%s477_s2] ss:$0 sm:$0xff]  ;;  %v142_v49 = vand.u32 127, %v141_v47  ;;  %vm211_vm7 = vcmp.ne.s32.totalorder %v179_v39, 0 }
   0x7   :  { %33 = vadd.xlane.f32.xlu0 %v32_v3  ;;  %281 = vmatprep.subr.bf16.mxu0 %v360_v15  ;;  %v178_v40 = vld [vmem:[%s479_s4] sm:$0xff]  ;;  %s363_s4 = smov [#allocation2]  }
   0x8   :  { %297 = vset.pattern.permute.xlu1 %v362_v34  ;;  %296 = vset.pattern.permute.xlu0 %v362_v34  ;;  %vm210_vm6 = vcmp.ne.s32.totalorder %v178_v40, 0  ;;  %s240_s13 = sshll.u32 %s363_s4, 4  ;;  %s241_s13 = int_to_ptr.vmem [resolvable:$true] %s240_s13 }
   0x9   :  { %s312_s14 = scalar_lea.vmem %s241_s13, 256  ;;  %p317_p1 = scmp.lt.s32.totalorder %s241_s13, %s241_s13 }
   0xa   :  { %282 = vmatpush3.bf16.msra.mxu0 %v299_v16  ;;  %p313_p0 = scmp.ne.s32.totalorder %s241_s13, %s312_s14  ;;  %p318_p2 = scmp.lt.s32.totalorder %s312_s14, %s312_s14 }
   0xc   :  { %p319_p3 = por %p318_p2, %p317_p1 }
   0xe   :  { %p320_p4 = pnand %p319_p3, %p313_p0 }
  0x90   :  { %v31_v4 = vpop.xlane.xlu0 %30 }
  0x91   :  { %v36_v5 = vmul.f32 0.03125, %v31_v4 }
  0x93   :  { %v38_v6 = vsub.f32 %v26_v0, %v36_v5 }
  0x94   :  { %v34_v7 = vpop.xlane.xlu0 %33 }
  0x95   :  { %v37_v8 = vmul.f32 0.03125, %v34_v7  ;;  %v40_v9 = vmul.f32 %v38_v6, %v38_v6 }
  0x97   :  { %v39_v10 = vsub.f32 %v27_v1, %v37_v8  ;;  %v42_v11 = vsel %vm28_vm0, %v40_v9, 0.0  ;;  %v274_v8 = vsel %vm210_vm6, 1.0, %v360_v15 }
  0x98   :  { %43 = vadd.xlane.f32.xlu1 %v42_v11 }
  0x99   :  { %v41_v12 = vmul.f32 %v39_v10, %v39_v10 }
  0x9b   :  { %v45_v13 = vsel %vm28_vm0, %v41_v12, 0.0 }
  0x9c   :  { %46 = vadd.xlane.f32.xlu1 %v45_v13  ;;  %v275_v13 = vsel %vm211_vm7, 1.0, %v360_v15 }
 0x125   :  { %v44_v17 = vpop.xlane.xlu1 %43 }
 0x126   :  { %v48_v18 = vmul.f32 0.03125, %v44_v17 }
 0x128   :  { %v50_v19 = vadd.f32 1e-05, %v48_v18 }
 0x129   :  { %v47_v20 = vpop.xlane.xlu1 %46 }
 0x12a   :  { %300 = vrsqrt.f32 %v50_v19  ;;  %v49_v21 = vmul.f32 0.03125, %v47_v20 }
 0x12c   :  { %v51_v22 = vadd.f32 1e-05, %v49_v21 }
 0x12e   :  { %302 = vrsqrt.f32 %v51_v22 }
 0x134   :  { %v301_v23 = vpop.eup %300 }
 0x135   :  { %v54_v24 = vmul.f32 %v301_v23, %v38_v6 }
 0x137   :  { %v63_v28 = vmul.f32 %v269_v25, %v54_v24 }
 0x138   :  { %v303_v26 = vpop.eup %302 }
 0x139   :  { %v55_v27 = vmul.f32 %v303_v26, %v39_v10  ;;  %v72_v31 = vadd.f32 %v270_v29, %v63_v28 }
 0x13b   :  { %v64_v30 = vmul.f32 %v269_v25, %v55_v27 }
 0x13d   :  { %v73_v32 = vadd.f32 %v270_v29, %v64_v30 }
 0x13f   :  { %v74_v33 = vpack.c.bf16 %v73_v32, %v72_v31 }
 0x141   :  { %284 = vmatmul.mubr.msk.bf16.vlgmr.msra.gmra.mrb[0].mxu0 %vm28_vm0, %v74_v33 }
 0x214   :  { %v128_v35 = vpop.f32.mrb[0].mxu0 }
 0x215   :  { %135 = vst [vmem:[#allocation2] sm:$0xff] %v128_v35  ;;  %137 = vmax.xlane.f32.xlu0 %v128_v35  ;;  %v285_v36 = vpop.f32.mrb[1].mxu0 }
 0x216   :  { %v131_v37 = vpop.f32.mrb[2].mxu0 }
 0x217   :  { %136 = vst [vmem:[#allocation2 + $0x8] sm:$0xff] %v131_v37  ;;  %139 = vmax.xlane.f32.xlu1 %v131_v37  ;;  %v286_v38 = vpop.f32.mrb[3].mxu0 }
 0x228   :  { %200 = vperm.xlu1 %297, %v179_v39  }
 0x22b   :  { %197 = vperm.xlu0 %296, %v178_v40  }
 0x2a2   :  { %v138_v41 = vpop.xlane.xlu0 %137 }
 0x2a3   :  { %v180_v42 = vsub.f32 %v128_v35, %v138_v41  ;;  %vm143_vm2 = vcmp.eq.f32.partialorder %v128_v35, %v138_v41 }
 0x2a4   :  { %v140_v43 = vpop.xlane.xlu1 %139  ;;  %v145_v54 = vsel %vm143_vm2, %v142_v49, 128 }
 0x2a5   :  { %v182_v44 = vmul.f32 1.442695, %v180_v42  ;;  %v181_v45 = vsub.f32 %v131_v37, %v140_v43  ;;  %vm144_vm4 = vcmp.eq.f32.partialorder %v131_v37, %v140_v43  ;;  %v148_v55 = vshra.s32 %v145_v54, 16 }
 0x2a6   :  { %v146_v57 = vsel %vm144_vm4, %v142_v49, 128  ;;  %v147_v21 = vand.u32 65535, %v145_v54 }
 0x2a7   :  { %304 = vpow2.f32 %v182_v44  ;;  %v184_v46 = vmul.f32 1.442695, %v181_v45  ;;  %v150_v58 = vcvt.s32.f32 %v148_v55  ;;  %v162_v59 = vshra.s32 %v146_v57, 16 }
 0x2a8   :  { %v201_v52 = vpop.permute.xlu1 %200  ;;  %v161_v4 = vand.u32 65535, %v146_v57  ;;  %v149_v23 = vcvt.s32.f32 %v147_v21 }
 0x2a9   :  { %306 = vpow2.f32 %v184_v46  ;;  %vm203_vm5 = vcmp.eq.s32.totalorder %v142_v49, %v201_v52  ;;  %v164_v60 = vcvt.s32.f32 %v162_v59 }
 0x2aa   :  { %v198_v48 = vpop.permute.xlu0 %197  ;;  %v205_v56 = vsel %vm203_vm5, %v131_v37, 0.0  ;;  %v163_v12 = vcvt.s32.f32 %v161_v4 }
 0x2ab   :  { %vm202_vm3 = vcmp.eq.s32.totalorder %v142_v49, %v198_v48 }
 0x2ac   :  { %v204_v53 = vsel %vm202_vm3, %v128_v35, 0.0 }
 0x2b1   :  { %v305_v50 = vpop.eup %304 }
 0x2b2   :  { %186 = vadd.xlane.f32.xlu1 %v305_v50 }
 0x2b3   :  { %v307_v51 = vpop.eup %306 }
 0x2b4   :  { %188 = vadd.xlane.f32.xlu0 %v307_v51 }
 0x2b6   :  { %206 = vadd.xlane.f32.xlu1 %v204_v53 }
 0x2ba   :  { %208 = vadd.xlane.f32.xlu1 %v205_v56 }
 0x2be   :  { %151 = vmin.xlane.f32.xlu1 %v150_v58 }
 0x2c2   :  { %165 = vmin.xlane.f32.xlu1 %v164_v60 }
 0x33f   :  { %v187_v61 = vpop.xlane.xlu1 %186 }
 0x340   :  { %308 = vlog2.f32 %v187_v61 }
 0x341   :  { %v189_v62 = vpop.xlane.xlu0 %188 }
 0x342   :  { %310 = vlog2.f32 %v189_v62 }
 0x343   :  { %v207_v63 = vpop.xlane.xlu1 %206 }
 0x347   :  { %v209_v0 = vpop.xlane.xlu1 %208 }
 0x34a   :  { %v309_v1 = vpop.eup %308 }
 0x34b   :  { %v191_v2 = vmul.f32 0.6931472, %v309_v1  ;;  %v152_v3 = vpop.xlane.xlu1 %151 }
 0x34c   :  { %v311_v5 = vpop.eup %310  ;;  %vm153_vm10 = vcmp.eq.f32.partialorder %v150_v58, %v152_v3 }
 0x34d   :  { %v193_v6 = vmul.f32 0.6931472, %v311_v5  ;;  %v194_v7 = vadd.f32 %v191_v2, %v138_v41  ;;  %v154_v24 = vsel %vm153_vm10, %v149_v23, inf }
 0x34f   :  { %v216_v9 = vsub.f32 %v194_v7, %v207_v63  ;;  %v195_v10 = vadd.f32 %v193_v6, %v140_v43  ;;  %v166_v11 = vpop.xlane.xlu1 %165 }
 0x350   :  { %vm167_vm8 = vcmp.eq.f32.partialorder %v164_v60, %v166_v11 }
 0x351   :  { %v218_v14 = vmul.f32 %v274_v8, %v216_v9  ;;  %v217_v16 = vsub.f32 %v195_v10, %v209_v0  ;;  %v168_v17 = vsel %vm167_vm8, %v163_v12, inf }
 0x352   :  { %169 = vmin.xlane.f32.xlu0 %v168_v17 }
 0x353   :  { %v219_v18 = vmul.f32 %v275_v13, %v217_v16  ;;  %v220_v19 = vsel %vm175_vm9, %v218_v14, 0.0 }
 0x355   :  { %v221_v20 = vsel %vm175_vm9, %v219_v18, 0.0 }
 0x356   :  { %v222_v22 = vadd.f32 %v221_v20, %v220_v19 }
 0x358   :  { %223 = vadd.xlane.f32.xlu1 %v222_v22 }
 0x35c   :  { %155 = vmin.xlane.f32.xlu1 %v154_v24 }
 0x35d   :  { %323 = shalt.err (!%p320_p4)
}
 0x35e   :  { %s324_s17 = scalar_lea.hbm %s480_s5, 256 }
 0x35f   :  { %p325_p5 = scmp.ne.s32.totalorder %s480_s5, %s324_s17  ;;  %p328_p6 = scmp.lt.u32.totalorder %s324_s17, %s480_s5 }
 0x361   :  { %p330_p7 = pnand %p328_p6, %p325_p5 }
 0x363   :  { %333 = shalt.err (!%p330_p7)
}
 0x364   :  { %s364_s22 = smov 128   ;;  %s365_s23 = smov 8   ;;  %v172_v15 = vcvt.f32.s32 %v166_v11  ;;  %v158_v30 = vcvt.f32.s32 %v152_v3  ;;  %vm233_vm11 = vcmask 0  }
 0x365   :  { %246 = dma.vmem_to_hbm [thread:$0]  %s241_s13, 256, %s480_s5, [#allocation3], %s364_s22, %s364_s22, %s365_s23  }
 0x366   :  { %v173_v26 = vshll.u32 %v172_v15, 16  ;;  %v159_v34 = vshll.u32 %v158_v30, 16  ;;  %s366_s28 = smov [#allocation4]  }
 0x367   :  { %s255_s29 = sshll.u32 %s366_s28, 4  ;;  %s256_s29 = int_to_ptr.vmem [resolvable:$true] %s255_s29 }
 0x368   :  { %s334_s8 = scalar_lea.vmem %s256_s29, 16  ;;  %s338_s9 = scalar_lea.vmem %s256_s29, 32 }
 0x369   :  { %p335_p8 = scmp.ne.s32.totalorder %s256_s29, %s334_s8  ;;  %p339_p9 = scmp.lt.s32.totalorder %s256_s29, %s256_s29 }
 0x36a   :  { %p340_p10 = scmp.lt.s32.totalorder %s338_s9, %s334_s8 }
 0x36c   :  { %p341_p11 = por %p340_p10, %p339_p9 }
 0x36e   :  { %p342_p12 = pnand %p341_p11, %p335_p8 }
 0x3df   :  { %v170_v25 = vpop.xlane.xlu0 %169 }
 0x3e0   :  { %v171_v27 = vcvt.f32.s32 %v170_v25 }
 0x3e2   :  { %v174_v28 = vadd.s32 %v173_v26, %v171_v27 }
 0x3e4   :  { %177 = vst.msk [vmem:[%s481_s6 + $0x8] sm:$0xff] %vm175_vm9, %v174_v28 }
 0x3e5   :  { %v224_v29 = vpop.xlane.xlu1 %223 }
 0x3e6   :  { %v225_v31 = vrot.slane %v224_v29, 4 }
 0x3e8   :  { %v226_v32 = vadd.f32 %v225_v31, %v224_v29 }
 0x3e9   :  { %v156_v33 = vpop.xlane.xlu1 %155 }
 0x3ea   :  { %v227_v35 = vrot.slane %v226_v32, 2  ;;  %v157_v36 = vcvt.f32.s32 %v156_v33 }
 0x3ec   :  { %v160_v37 = vadd.s32 %v159_v34, %v157_v36  ;;  %v228_v38 = vadd.f32 %v227_v35, %v226_v32 }
 0x3ee   :  { %176 = vst.msk [vmem:[%s481_s6] sm:$0xff] %vm175_vm9, %v160_v37  ;;  %v229_v39 = vrot.slane %v228_v38, 1 }
 0x3f0   :  { %v230_v40 = vadd.f32 %v229_v39, %v228_v38 }
 0x3f2   :  { %287 = vpush %v230_v40 }
 0x423   :  { %s288_s30 = spop %287 }
 0x424   :  { %v232_v41 = vstv %s288_s30 }
 0x425   :  { %234 = vst.msk [vmem:[#allocation4] sm:$0x1] %vm233_vm11, %v232_v41 }
 0x426   :  { %345 = shalt.err (!%p342_p12)
}
 0x427   :  { %s346_s10 = scalar_lea.hbm %s482_s7, 16 }
 0x428   :  { %p347_p13 = scmp.ne.s32.totalorder %s482_s7, %s346_s10  ;;  %p350_p0 = scmp.lt.u32.totalorder %s346_s10, %s482_s7 }
 0x42a   :  { %p352_p1 = pnand %p350_p0, %p347_p13 }
 0x42c   :  { %355 = shalt.err (!%p352_p1)
}
 0x42d   :  { %258 = dma.vmem_to_hbm [thread:$0]  %s256_s29, 16, %s482_s7, [#allocation5]  }
 0x42e   :  { %356 = dma.done.wait [#allocation3], 256  }
 0x42f   :  { %357 = vsyncadd [#allocation3], 4294967040 }
 0x430   :  { %358 = dma.done.wait [#allocation5], 16  }
 0x431   :  { %359 = vsyncadd [#allocation5], 4294967280 }
 0x432   :  { %267 = vsyncpa [#allocation3], 1 }
 0x433   :  { %268 = vsyncpa [#allocation5], 1 }

// kernel: new_gpt_forward.2
= control target key start
LH: loop header
LB: loop body
LE: loop exit
PB: predicated region body
PF: predicated region fallthrough
CT: control target
= control target key end

     0   :  { %s2225_s21 = smov 0   ;;  %s2509_s0 = inlined_call_operand.vmem [shape: f32[16,32], index: 0, kind: input, shape index: {}]   ;;  %s2510_s1 = inlined_call_operand.vmem [shape: f32[8,48], index: 1, kind: input, shape index: {}]   ;;  %s2511_s2 = inlined_call_operand.vmem [shape: f32[2,8], index: 2, kind: input, shape index: {}]   ;;  %s2512_s3 = inlined_call_operand.vmem [shape: bf16[48,32], index: 3, kind: input, shape index: {}]   ;;  %s2513_s4 = inlined_call_operand.vmem [shape: f32[2,1,32], index: 4, kind: input, shape index: {}]   ;;  %s2514_s5 = inlined_call_operand.vmem [shape: f32[2,1,32], index: 5, kind: input, shape index: {}]   ;;  %s2515_s6 = inlined_call_operand.vmem [shape: bf16[2,32,96], index: 6, kind: input, shape index: {}]   ;;  %s2516_s7 = inlined_call_operand.vmem [shape: f32[2,1,96], index: 7, kind: input, shape index: {}]   ;;  %s2517_s8 = inlined_call_operand.vmem [shape: bf16[2,32,32], index: 8, kind: input, shape index: {}]   ;;  %s2518_s9 = inlined_call_operand.vmem [shape: f32[2,1,32], index: 9, kind: input, shape index: {}]   ;;  %s2519_s10 = inlined_call_operand.vmem [shape: f32[2,1,32], index: 10, kind: input, shape index: {}]   ;;  %s2520_s11 = inlined_call_operand.vmem [shape: f32[2,1,32], index: 11, kind: input, shape index: {}]   ;;  %s2521_s12 = inlined_call_operand.vmem [shape: bf16[2,32,128], index: 12, kind: input, shape index: {}]   ;;  %s2522_s13 = inlined_call_operand.vmem [shape: f32[2,1,128], index: 13, kind: input, shape index: {}]   ;;  %s2523_s14 = inlined_call_operand.vmem [shape: bf16[2,128,32], index: 14, kind: input, shape index: {}]   ;;  %s2524_s15 = inlined_call_operand.vmem [shape: f32[2,1,32], index: 15, kind: input, shape index: {}]   ;;  %s2525_s16 = inlined_call_operand.vmem [shape: f32[16,32], index: 16, kind: output, shape index: {}]  }
   0x1   :  { %2529 = sst [smem:[#allocation6_spill]] %s2509_s0 }
   0x2   :  { %2530 = sst [smem:[#allocation7_spill]] %s2511_s2 }
   0x3   :  { %2531 = sst [smem:[#allocation8_spill]] %s2513_s4 }
   0x4   :  { %2532 = sst [smem:[#allocation9_spill]] %s2514_s5 }
   0x5   :  { %2533 = sst [smem:[#allocation10_spill]] %s2515_s6 }
   0x6   :  { %2534 = sst [smem:[#allocation11_spill]] %s2517_s8 }
   0x7 LB: > { %2535 = sst [smem:[#allocation4_spill]] %s2126_s21  ;;  %s1855_s22 = sadd.s32 4294967295, %s2126_s21   ;;  %s2126_s21 = sphi %s2225_s21, %s26_s21  }
   0x8   : > { %p1858_p0 = scmp.ge.s32.totalorder %s2126_s21, 1  ;;  %p551_p1 = scmp.lt.s32.totalorder %s2126_s21, 3 }
   0xa   : > { %p552_p2 = pnand %p1858_p0, %p551_p1 }
   0xc   : > { %555 = sbr.rel (%p552_p2) target bundleno = 2844 (0xb1c), region = 84 }
  0x13   : > { %p635_p3 = scmp.lt.s32.totalorder %s1855_s22, 1  ;;  %s2538_s6 = sld [smem:[#allocation10_spill]] }
  0x14   : > { %s2539_s8 = sld [smem:[#allocation11_spill]]  ;;  %p1867_p4 = scmp.ne.s32.totalorder %s1855_s22, 0 }
  0x15   : > { %s2233_s23 = scalar_select %p635_p3, %s1855_s22, 1 }
  0x16   : > { %683 = sbr.rel (%p1867_p4) target bundleno = 250 (0xfa), region = 88  ;;  %v2073_v0 = vld [vmem:[%s2512_s3] sm:$0xff] (!%p1867_p4)   ;;  %v2128_v1 = vmov (!%p1867_p4), 0.0   ;;  %v2074_v2 = vld [vmem:[%s2512_s3 + $0x8] sm:$0xff] (!%p1867_p4)   ;;  %vm2129_vm0 = vmmov (!%p1867_p4), 0   ;;  %s2541_s25 = sld [smem:[#allocation6_spill]] (!%p1867_p4) }
  0x17   : > { %s1908_s30 = sshll.u32 %s2233_s23, 4  ;;  %s659_s5 = scalar_lea.vmem %s2519_s10, %s2233_s23  ;;  %1951 = vmatprep.subr.bf16.mxu0 (!%p1867_p4), %v2128_v1  ;;  %1957 = vmatprep.mubr.msk.bf16.mxu0 (!%p1867_p4), %vm2129_vm0, %v2128_v1  ;;  %vm686_vm1 = vcmask (!%p1867_p4), 261120   ;;  %v2075_v5 = vld [vmem:[%s2512_s3 + $0x10] sm:$0xff] (!%p1867_p4)   ;;  %v689_v6 = vld [vmem:[%s2510_s1] sm:$0xff] (!%p1867_p4)  ;;  %vm715_vm2 = vcmask (!%p1867_p4), 392192  }
  0x18   : > { %s662_s18 = scalar_lea.vmem %s2520_s11, %s2233_s23  ;;  %s678_s0 = scalar_lea.vmem %s2524_s15, %s2233_s23  ;;  %1952 = vmatpush3.bf16.msra.mxu0 (!%p1867_p4), %v2073_v0  ;;  %v690_v7 = vpack.c.bf16 (!%p1867_p4), %v689_v6, %v689_v6 }
  0x19   : > { %s2251_s24 = scalar_lea.vmem %s2538_s6, %s1908_s30  ;;  %s2273_s6 = scalar_lea.vmem %s2521_s12, %s1908_s30  ;;  %1953 = vmatprep.subr.bf16.mxu0 (!%p1867_p4), %v2128_v1 }
  0x1a   : > { %s2256_s2 = scalar_lea.vmem %s2539_s8, %s1908_s30  ;;  %s670_s8 = scalar_lea.vmem %s2522_s13, %s2233_s23 }
  0x1b   : > { %2540 = sst [smem:[#allocation5_spill]] %s2256_s2  ;;  %s1911_s2 = sshll.u32 %s2233_s23, 6 }
  0x1c   : > { %s2283_s27 = scalar_lea.vmem %s2523_s14, %s1911_s2  ;;  %v684_v3 = vld [vmem:[%s2541_s25] sm:$0xff] (!%p1867_p4)  ;;  %v685_v4 = vld [vmem:[%s2541_s25 + $0x8] sm:$0xff] (!%p1867_p4)  ;;  %1954 = vmatpush3.bf16.msra.mxu0 (!%p1867_p4), %v2074_v2 }
  0x1d   : > { %687 = vst.msk [vmem:[%s2525_s16] sm:$0xff] %vm686_vm1, %v684_v3  ;;  %688 = vst.msk [vmem:[%s2525_s16 + $0x8] sm:$0xff] %vm686_vm1, %v685_v4  ;;  %1955 = vmatprep.subr.bf16.mxu0 %v2128_v1 }
  0x20   : > { %1956 = vmatpush3.bf16.msra.mxu0 %v2075_v5 }
  0x23   : > { %1958 = vmatmul.mubr.msk.bf16.vlgmr.msra.gmra.mrb[0].mxu0 %vm715_vm2, %v690_v7 }
  0xf6   : > { %v753_v8 = vpop.f32.mrb[0].mxu0 }
  0xf7   : > { %759 = vst.msk [vmem:[#allocation2] sm:$0xff] %vm686_vm1, %v753_v8  ;;  %v1959_v9 = vpop.f32.mrb[1].mxu0 }
  0xf8   : > { %v756_v10 = vpop.f32.mrb[2].mxu0 }
  0xf9   : > { %v1960_v11 = vpop.f32.mrb[3].mxu0 }
  0xfa PF: > { %vm766_vm3 = vcmask 261120   ;;  %v2076_v33 = vld [vmem:[%s2251_s24] sm:$0xff]   ;;  %v2077_v34 = vld [vmem:[%s2251_s24 + $0x8] sm:$0xff]   ;;  %s2542_s28 = sld [smem:[#allocation8_spill]]  ;;  %s2544_s20 = sld [smem:[#allocation9_spill]]  ;;  %v2130_v60 = vmov 0.0  }
  0xfb   : > { %1961 = vmatprep.subr.bf16.mxu0 %v2076_v33  ;;  %1981 = vmatprep.subr.bf16.mxu1 %v2130_v60  ;;  %s2546_s4 = scalar_lea.vmem %s2516_s7, %s2233_s23  ;;  %vm2131_vm4 = vmmov 0   ;;  %s2132_s26 = smov 80   ;;  %vm927_vm5 = vcmask 130048   ;;  %vm912_vm6 = vcmask 64512   ;;  %vm976_vm13 = vcmask 97280  }
  0xfc   : > { %1962 = vmatpush3.bf16.msra.mxu0 %v2076_v33  ;;  %v1874_v61 = vld [vmem:[%s2546_s4] ss:$0 sm:$0xff]  ;;  %1983 = vmatprep.mubr.msk.bf16.mxu1 %vm2131_vm4, %v2130_v60  ;;  %s2133_s24 = smov 96   ;;  %s2134_s29 = smov 112   ;;  %vm994_vm0 = vcmask 1045504   ;;  %vm1156_vm1 = vcmask 261248  }
  0xfd   : > { %1963 = vmatprep.subr.bf16.mxu0 %v2077_v34  ;;  %s2547_s19 = sld [smem:[#allocation7_spill]]  ;;  %s2137_s30 = smov 48  }
  0xfe   : > { %v762_v13 = vld [vmem:[#allocation2] sm:$0xff]  ;;  %s2139_s21 = smov 16  }
  0xff   : > { %v773_v16 = vsel %vm766_vm3, %v762_v13, 0.0 }
 0x100   : > { %774 = vadd.xlane.f32.xlu1 %v773_v16  ;;  %1964 = vmatpush3.bf16.msra.mxu0 %v2077_v34  ;;  %s2543_s17 = scalar_lea.vmem %s2542_s28, %s2233_s23  ;;  %s2545_s2 = scalar_lea.vmem %s2544_s20, %s2233_s23 }
 0x101   : > { %v2316_v12 = vld [vmem:[%s2525_s16] sm:$0xff]  ;;  %v2321_v14 = vld [vmem:[%s2525_s16 + $0x8] sm:$0xff]  ;;  %1969 = vmatprep.subr.bf16.mxu0 %v2130_v60  ;;  %s2138_s20 = smov 64  }
 0x102   : > { %v767_v15 = vsel %vm766_vm3, %v2316_v12, 0.0  ;;  %v770_v17 = vsel %vm766_vm3, %v2321_v14, 0.0  ;;  %v1872_v46 = vld [vmem:[%s2543_s17] ss:$0 sm:$0xff] }
 0x103   : > { %768 = vadd.xlane.f32.xlu0 %v767_v15  ;;  %v1873_v52 = vld [vmem:[%s2545_s2] ss:$0 sm:$0xff]  ;;  %s2550_s2 = sld [smem:[#allocation5_spill]] }
 0x107   : > { %771 = vadd.xlane.f32.xlu0 %v770_v17 }
 0x18d   : > { %v775_v19 = vpop.xlane.xlu1 %774 }
 0x18e   : > { %v779_v21 = vmul.f32 0.03125, %v775_v19 }
 0x190   : > { %v769_v18 = vpop.xlane.xlu0 %768  ;;  %v782_v23 = vsub.f32 %v762_v13, %v779_v21 }
 0x191   : > { %v777_v20 = vmul.f32 0.03125, %v769_v18 }
 0x192   : > { %v785_v27 = vmul.f32 %v782_v23, %v782_v23 }
 0x193   : > { %v780_v22 = vsub.f32 %v2316_v12, %v777_v20 }
 0x194   : > { %v772_v24 = vpop.xlane.xlu0 %771  ;;  %v792_v30 = vsel %vm766_vm3, %v785_v27, 0.0 }
 0x195   : > { %v778_v25 = vmul.f32 0.03125, %v772_v24  ;;  %v783_v26 = vmul.f32 %v780_v22, %v780_v22 }
 0x197   : > { %v781_v28 = vsub.f32 %v2321_v14, %v778_v25  ;;  %v786_v29 = vsel %vm766_vm3, %v783_v26, 0.0 }
 0x198   : > { %787 = vadd.xlane.f32.xlu1 %v786_v29 }
 0x199   : > { %v784_v31 = vmul.f32 %v781_v28, %v781_v28 }
 0x19b   : > { %v789_v32 = vsel %vm766_vm3, %v784_v31, 0.0 }
 0x19c   : > { %793 = vadd.xlane.f32.xlu1 %v792_v30  ;;  %790 = vadd.xlane.f32.xlu0 %v789_v32 }
 0x225   : > { %v788_v35 = vpop.xlane.xlu1 %787 }
 0x226   : > { %v795_v36 = vmul.f32 0.03125, %v788_v35 }
 0x228   : > { %v798_v37 = vadd.f32 1e-05, %v795_v36  ;;  %v2136_v36 = vmov -1e+09  }
 0x229   : > { %v794_v38 = vpop.xlane.xlu1 %793  ;;  %v791_v39 = vpop.xlane.xlu0 %790 }
 0x22a   : > { %2090 = vrsqrt.f32 %v798_v37  ;;  %v797_v40 = vmul.f32 0.03125, %v794_v38  ;;  %v796_v41 = vmul.f32 0.03125, %v791_v39 }
 0x22c   : > { %v800_v42 = vadd.f32 1e-05, %v797_v40  ;;  %v799_v43 = vadd.f32 1e-05, %v796_v41 }
 0x22e   : > { %2092 = vrsqrt.f32 %v800_v42 }
 0x22f   : > { %2094 = vrsqrt.f32 %v799_v43 }
 0x234   : > { %v2091_v44 = vpop.eup %2090 }
 0x235   : > { %v804_v45 = vmul.f32 %v2091_v44, %v780_v22  ;;  %v763_v22 = vld [vmem:[%s2547_s19] sm:$0x3] }
 0x236   : > { %v913_v24 = vsel %vm912_vm6, %v763_v22, 1.0 }
 0x237   : > { %v813_v51 = vmul.f32 %v1872_v46, %v804_v45  ;;  %vm914_vm7 = vcmp.gt.f32.partialorder %v913_v24, 0.5 }
 0x238   : > { %v2093_v47 = vpop.eup %2092 }
 0x239   : > { %v2095_v48 = vpop.eup %2094  ;;  %v806_v49 = vmul.f32 %v2093_v47, %v782_v23  ;;  %v822_v56 = vadd.f32 %v1873_v52, %v813_v51  ;;  %v904_v23 = vlaneseq }
 0x23a   : > { %v805_v50 = vmul.f32 %v2095_v48, %v781_v28  ;;  %v2135_v28 = vmov 0  }
 0x23b   : > { %v815_v53 = vmul.f32 %v1872_v46, %v806_v49  ;;  %v907_v25 = vshrl.u32 %v904_v23, 7  ;;  %v905_v27 = vand.u32 127, %v904_v23  ;;  %v915_v29 = vsel %vm914_vm7, 1, %v2135_v28 }
 0x23c   : > { %v814_v54 = vmul.f32 %v1872_v46, %v805_v50 }
 0x23d   : > { %v824_v55 = vadd.f32 %v1873_v52, %v815_v53  ;;  %v918_v26 = vsub.s32 0, %v907_v25  ;;  %vm908_vm8 = vcmp.ge.s32.totalorder %v905_v27, 8  ;;  %vm909_vm9 = vcmp.le.s32.totalorder %v905_v27, %v907_v25 }
 0x23e   : > { %v823_v57 = vadd.f32 %v1873_v52, %v814_v54  ;;  %vm2389_vm10 = vmor %vm908_vm8, %vm909_vm9  ;;  %v1164_v32 = vsub.s32 1, %v907_v25 }
 0x23f   : > { %v826_v58 = vpack.c.bf16 %v824_v55, %v824_v55  ;;  %v919_v30 = vrot.slane %v915_v29, %v918_v26 }
 0x240   : > { %v825_v59 = vpack.c.bf16 %v823_v57, %v822_v56  ;;  %v1165_v33 = vrot.slane %v915_v29, %v1164_v32 }
 0x241   : > { %vm920_vm11 = vcmp.eq.s32.totalorder %v919_v30, 1 }
 0x242   : > { %1965 = vmatprep.mubr.msk.bf16.mxu0 %vm766_vm3, %v825_v59  ;;  %vm921_vm12 = vmand %vm2389_vm10, %vm920_vm11  ;;  %vm1166_vm14 = vcmp.eq.s32.totalorder %v1165_v33, 1 }
 0x243   : > { %1966 = vmatmul.mubr.msk.bf16.vlgmr.msra.gmra.mrb[0].mxu0 %vm766_vm3, %v826_v58  ;;  %v922_v37 = vsel %vm921_vm12, 0.0, %v2136_v36  ;;  %vm1167_vm15 = vmand %vm2389_vm10, %vm1166_vm14 }
 0x244   : > { %1971 = vmatprep.mubr.msk.bf16.mxu0 %vm2131_vm4, %v2130_v60  ;;  %v1168_v51 = vsel %vm1167_vm15, 0.0, %v2136_v36 }
 0x316   : > { %v1967_v62 = vpop.f32.mrb[0].mxu0 }
 0x317   : > { %v899_v63 = vadd.f32 %v1967_v62, %v1874_v61  ;;  %v890_v0 = vpop.f32.mrb[1].mxu0 }
 0x318   : > { %v891_v1 = vadd.f32 %v1874_v61, %v890_v0  ;;  %v1968_v2 = vpop.f32.mrb[2].mxu0 }
 0x319   : > { %v1159_v3 = vrot.slane %v899_v63, 4  ;;  %v893_v4 = vpop.f32.mrb[3].mxu0 }
 0x31a   : > { %v2358_v5 = vpack.c.bf16 %v899_v63, %v891_v1  ;;  %v894_v6 = vadd.f32 %v1874_v61, %v893_v4  ;;  %v923_v8 = vpack.c.bf16 %v891_v1, %v891_v1 }
 0x31c   : > { %v2360_v7 = vpack.c.bf16 %v1159_v3, %v894_v6  ;;  %1042 = vrot.lane.b32.xlu1 %v2358_v5, %s2132_s26  ;;  %925 = vrot.lane.b32.xlu0 %v2358_v5, %s2133_s24  ;;  %v1169_v9 = vpack.c.bf16 %v894_v6, %v894_v6 }
 0x320   : > { %1040 = vrot.lane.b32.xlu1 %v923_v8, %s2134_s29  ;;  %1285 = vrot.lane.b32.xlu0 %v2360_v7, %s2132_s26  ;;  %s2551_s26 = scalar_lea.vmem %s2518_s9, %s2233_s23 }
 0x324   : > { %1171 = vrot.lane.b32.xlu1 %v2360_v7, %s2133_s24 }
 0x328   : > { %1283 = vrot.lane.b32.xlu1 %v1169_v9, %s2134_s29 }
 0x38e   : > { %v1043_v10 = vpop.permute.xlu1 %1042  ;;  %v926_v11 = vpop.permute.xlu0 %925 }
 0x38f   : > { %v932_v13 = vsel %vm927_vm5, %v926_v11, 0  ;;  %v1048_v15 = vsel %vm927_vm5, %v1043_v10, 0 }
 0x390   : > { %1970 = vmatpush3.bf16.xpose.msra.mxu0 %v932_v13  ;;  %1982 = vmatpush3.bf16.xpose.msra.mxu1 %v1048_v15 }
 0x391   : > { %1993 = vmatprep.subr.bf16.mxu1 %v2130_v60  ;;  %1975 = vmatprep.subr.bf16.mxu0 %v2130_v60 }
 0x392   : > { %v1041_v16 = vpop.permute.xlu1 %1040  ;;  %v1286_v19 = vpop.permute.xlu0 %1285 }
 0x393   : > { %v1291_v20 = vsel %vm927_vm5, %v1286_v19, 0 }
 0x396   : > { %v1172_v17 = vpop.permute.xlu1 %1171 }
 0x397   : > { %v1177_v18 = vsel %vm927_vm5, %v1172_v17, 0  ;;  %1972 = vmatmul.mubr.msk.bf16.vlgmr.msra.gmra.mrb[4].mxu0 %vm927_vm5, %v923_v8  ;;  %1984 = vmatmul.mubr.msk.bf16.vlgmr.msra.gmra.mrb[0].mxu1 %vm927_vm5, %v1041_v16 }
 0x398   : > { %1994 = vmatpush3.bf16.xpose.msra.mxu1 %v1177_v18  ;;  %1995 = vmatprep.mubr.msk.bf16.mxu1 %vm2131_vm4, %v2130_v60 }
 0x399   : > { %2005 = vmatprep.subr.bf16.mxu1 %v2130_v60  ;;  %1977 = vmatprep.mubr.msk.bf16.mxu0 %vm2131_vm4, %v2130_v60 }
 0x39a   : > { %v1284_v21 = vpop.permute.xlu1 %1283 }
 0x39f   : > { %1996 = vmatmul.mubr.msk.bf16.vlgmr.msra.gmra.mrb[4].mxu1 %vm927_vm5, %v1169_v9 }
 0x3a0   : > { %2006 = vmatpush3.bf16.xpose.msra.mxu1 %v1291_v20  ;;  %2007 = vmatprep.mubr.msk.bf16.mxu1 %vm2131_vm4, %v2130_v60 }
 0x3a1   : > { %2017 = vmatprep.subr.bf16.mxu1 %v2130_v60 }
 0x3a7   : > { %2008 = vmatmul.mubr.msk.bf16.vlgmr.msra.gmra.mrb[8].mxu1 %vm927_vm5, %v1284_v21 }
 0x3a8   : > { %2021 = vmatprep.mubr.msk.bf16.mxu1 %vm2131_vm4, %v2130_v60 }
 0x46a   : > { %v968_v34 = vpop.f32.mrb[4].mxu0  ;;  %v1084_v35 = vpop.f32.mrb[0].mxu1 }
 0x46b   : > { %v974_v38 = vmul.f32 0.25, %v968_v34  ;;  %v1090_v39 = vmul.f32 0.25, %v1084_v35  ;;  %v1973_v40 = vpop.f32.mrb[5].mxu0  ;;  %v1985_v41 = vpop.f32.mrb[1].mxu1 }
 0x46c   : > { %v971_v42 = vpop.f32.mrb[6].mxu0  ;;  %v1087_v43 = vpop.f32.mrb[2].mxu1 }
 0x46d   : > { %v1974_v44 = vpop.f32.mrb[7].mxu0  ;;  %v1986_v45 = vpop.f32.mrb[3].mxu1  ;;  %v1091_v46 = vadd.f32 %v1090_v39, %v922_v37  ;;  %v975_v47 = vadd.f32 %v974_v38, %v922_v37 }
 0x46f   : > { %v1092_v48 = vsel %vm976_vm13, %v1091_v46, -inf  ;;  %v977_v49 = vsel %vm976_vm13, %v975_v47, -inf }
 0x470   : > { %1093 = vmax.xlane.f32.xlu1 %v1092_v48  ;;  %978 = vmax.xlane.f32.xlu0 %v977_v49 }
 0x472   : > { %v1213_v50 = vpop.f32.mrb[4].mxu1 }
 0x473   : > { %v1219_v52 = vmul.f32 0.25, %v1213_v50  ;;  %v1997_v53 = vpop.f32.mrb[5].mxu1 }
 0x474   : > { %v1216_v54 = vpop.f32.mrb[6].mxu1 }
 0x475   : > { %v1998_v55 = vpop.f32.mrb[7].mxu1  ;;  %v1220_v56 = vadd.f32 %v1219_v52, %v1168_v51 }
 0x477   : > { %v1221_v57 = vsel %vm976_vm13, %v1220_v56, -inf }
 0x478   : > { %1222 = vmax.xlane.f32.xlu0 %v1221_v57 }
 0x47a   : > { %v1327_v58 = vpop.f32.mrb[8].mxu1 }
 0x47b   : > { %v1333_v59 = vmul.f32 0.25, %v1327_v58  ;;  %v2009_v61 = vpop.f32.mrb[9].mxu1 }
 0x47c   : > { %v1330_v62 = vpop.f32.mrb[10].mxu1  ;;  %v2078_v61 = vld [vmem:[%s2550_s2] sm:$0xff]  }
 0x47d   : > { %v2010_v63 = vpop.f32.mrb[11].mxu1  ;;  %v1334_v0 = vadd.f32 %v1333_v59, %v1168_v51  ;;  %2018 = vmatpush3.bf16.msra.mxu1 %v2078_v61  ;;  %v2079_v62 = vld [vmem:[%s2550_s2 + $0x8] sm:$0xff]  }
 0x47e   : > { %2019 = vmatprep.subr.bf16.mxu1 %v2130_v60 }
 0x47f   : > { %v1335_v1 = vsel %vm976_vm13, %v1334_v0, -inf }
 0x480   : > { %1336 = vmax.xlane.f32.xlu0 %v1335_v1 }
 0x481   : > { %2020 = vmatpush3.bf16.msra.mxu1 %v2079_v62 }
 0x482   : > { %2033 = vmatprep.subr.bf16.mxu1 %v2130_v60 }
 0x4fd   : > { %v1094_v2 = vpop.xlane.xlu1 %1093  ;;  %v979_v3 = vpop.xlane.xlu0 %978 }
 0x4fe   : > { %v1095_v4 = vsub.f32 %v1091_v46, %v1094_v2  ;;  %v980_v6 = vsub.f32 %v975_v47, %v979_v3 }
 0x500   : > { %v1096_v8 = vmul.f32 1.442695, %v1095_v4  ;;  %v981_v9 = vmul.f32 1.442695, %v980_v6 }
 0x502   : > { %2096 = vpow2.f32 %v1096_v8 }
 0x503   : > { %2098 = vpow2.f32 %v981_v9 }
 0x505   : > { %v1223_v10 = vpop.xlane.xlu0 %1222 }
 0x506   : > { %v1224_v11 = vsub.f32 %v1220_v56, %v1223_v10  ;;  %v1887_v10 = vld [vmem:[%s2551_s26] ss:$0 sm:$0xff] }
 0x508   : > { %v1225_v13 = vmul.f32 1.442695, %v1224_v11 }
 0x50a   : > { %2100 = vpow2.f32 %v1225_v13 }
 0x50c   : > { %v2097_v15 = vpop.eup %2096 }
 0x50d   : > { %v2099_v16 = vpop.eup %2098  ;;  %v1098_v17 = vsel %vm976_vm13, %v2097_v15, 0.0  ;;  %v1337_v21 = vpop.xlane.xlu0 %1336 }
 0x50e   : > { %1099 = vadd.xlane.f32.xlu1 %v1098_v17  ;;  %v983_v18 = vsel %vm976_vm13, %v2099_v16, 0.0  ;;  %v1338_v22 = vsub.f32 %v1334_v0, %v1337_v21 }
 0x50f   : > { %984 = vadd.xlane.f32.xlu0 %v983_v18 }
 0x510   : > { %v1339_v23 = vmul.f32 1.442695, %v1338_v22 }
 0x512   : > { %2102 = vpow2.f32 %v1339_v23 }
 0x514   : > { %v2101_v19 = vpop.eup %2100 }
 0x515   : > { %v1227_v20 = vsel %vm976_vm13, %v2101_v19, 0.0 }
 0x516   : > { %1228 = vadd.xlane.f32.xlu0 %v1227_v20 }
 0x51c   : > { %v2103_v24 = vpop.eup %2102 }
 0x51d   : > { %v1341_v25 = vsel %vm976_vm13, %v2103_v24, 0.0 }
 0x51f   : > { %1104 = vrot.lane.b32.xlu1 %v2358_v5, %s2137_s30 }
 0x523   : > { %1233 = vrot.lane.b32.xlu1 %v2360_v7, %s2138_s20 }
 0x52c   : > { %989 = vrot.lane.b32.xlu0 %v2358_v5, %s2138_s20 }
 0x547   : > { %1342 = vadd.xlane.f32.xlu1 %v1341_v25 }
 0x558   : > { %1347 = vrot.lane.b32.xlu1 %v2360_v7, %s2137_s30 }
 0x59b   : > { %v1100_v27 = vpop.xlane.xlu1 %1099 }
 0x59c   : > { %v985_v26 = vpop.xlane.xlu0 %984 }
 0x59d   : > { %2104 = vrcp.f32 %v985_v26 }
 0x59e   : > { %2106 = vrcp.f32 %v1100_v27 }
 0x59f   : > { %v1105_v32 = vpop.permute.xlu1 %1104 }
 0x5a0   : > { %v1110_v7 = vsel %vm994_vm0, %v1105_v32, 0 }
 0x5a3   : > { %v1229_v28 = vpop.xlane.xlu0 %1228  ;;  %v1234_v36 = vpop.permute.xlu1 %1233 }
 0x5a4   : > { %2108 = vrcp.f32 %v1229_v28  ;;  %v1239_v39 = vsel %vm994_vm0, %v1234_v36, 0 }
 0x5a7   : > { %v2105_v29 = vpop.eup %2104  ;;  %v990_v30 = vpop.permute.xlu0 %989 }
 0x5a8   : > { %v987_v31 = vmul.f32 %v2105_v29, %v2099_v16  ;;  %v996_v5 = vsel %vm994_vm0, %v990_v30, 0  ;;  %v2107_v34 = vpop.eup %2106 }
 0x5a9   : > { %1976 = vmatpush3.bf16.msra.mxu0 %v996_v5  ;;  %v1102_v35 = vmul.f32 %v2107_v34, %v2097_v15  ;;  %v2081_v5 = vld [vmem:[%s2273_s6 + $0x8] sm:$0xff]  }
 0x5aa   : > { %v988_v33 = vpack.c.bf16 %v987_v31, %v987_v31  ;;  %1987 = vmatprep.subr.bf16.mxu0 %v2130_v60  ;;  %v2080_v31 = vld [vmem:[%s2273_s6] sm:$0xff]  }
 0x5ab   : > { %v1103_v37 = vpack.c.bf16 %v1102_v35, %v1102_v35 }
 0x5ac   : > { %1978 = vmatmul.mubr.msk.bf16.vlgmr.msra.gmra.mrb[8].mxu0 %vm976_vm13, %v988_v33 }
 0x5ad   : > { %1988 = vmatpush3.bf16.msra.mxu0 %v1110_v7  ;;  %1989 = vmatprep.mubr.msk.bf16.mxu0 %vm2131_vm4, %v2130_v60 }
 0x5ae   : > { %1999 = vmatprep.subr.bf16.mxu0 %v2130_v60  ;;  %v2109_v38 = vpop.eup %2108 }
 0x5af   : > { %v1231_v40 = vmul.f32 %v2109_v38, %v2101_v19 }
 0x5b1   : > { %v1232_v41 = vpack.c.bf16 %v1231_v40, %v1231_v40 }
 0x5b4   : > { %1990 = vmatmul.mubr.msk.bf16.vlgmr.msra.gmra.mrb[12].mxu0 %vm976_vm13, %v1103_v37 }
 0x5b5   : > { %2000 = vmatpush3.bf16.msra.mxu0 %v1239_v39  ;;  %2001 = vmatprep.mubr.msk.bf16.mxu0 %vm2131_vm4, %v2130_v60  ;;  %v1891_v39 = vld [vmem:[%s659_s5] ss:$0 sm:$0xff] }
 0x5b6   : > { %2011 = vmatprep.subr.bf16.mxu0 %v2130_v60 }
 0x5bc   : > { %2002 = vmatmul.mubr.msk.bf16.vlgmr.msra.gmra.mrb[16].mxu0 %vm976_vm13, %v1232_v41 }
 0x5bd   : > { %2013 = vmatprep.mubr.msk.bf16.mxu0 %vm2131_vm4, %v2130_v60 }
 0x5d4   : > { %v1343_v42 = vpop.xlane.xlu1 %1342 }
 0x5d5   : > { %2110 = vrcp.f32 %v1343_v42 }
 0x5d8   : > { %v1348_v43 = vpop.permute.xlu1 %1347 }
 0x5d9   : > { %v1353_v44 = vsel %vm994_vm0, %v1348_v43, 0  ;;  %v1892_v43 = vld [vmem:[%s662_s18] ss:$0 sm:$0xff] }
 0x5da   : > { %2012 = vmatpush3.bf16.msra.mxu0 %v1353_v44 }
 0x5db   : > { %2025 = vmatprep.subr.bf16.mxu0 %v2130_v60 }
 0x5df   : > { %v2111_v45 = vpop.eup %2110 }
 0x5e0   : > { %v1345_v46 = vmul.f32 %v2111_v45, %v2103_v24 }
 0x5e2   : > { %v1346_v47 = vpack.c.bf16 %v1345_v46, %v1345_v46 }
 0x5e4   : > { %2014 = vmatmul.mubr.msk.bf16.vlgmr.msra.gmra.mrb[20].mxu0 %vm976_vm13, %v1346_v47 }
 0x5e5   : > { %2029 = vmatprep.mubr.msk.bf16.mxu0 %vm2131_vm4, %v2130_v60  ;;  %2026 = vmatpush3.bf16.msra.mxu0 %v2080_v31 }
 0x5e6   : > { %2027 = vmatprep.subr.bf16.mxu0 %v2130_v60 }
 0x5e9   : > { %2028 = vmatpush3.bf16.msra.mxu0 %v2081_v5 }
 0x67f   : > { %v1032_v48 = vpop.f32.mrb[8].mxu0 }
 0x680   : > { %1038 = vst.msk [vmem:[#allocation3] sm:$0xff] %vm927_vm5, %v1032_v48  ;;  %v1979_v49 = vpop.f32.mrb[9].mxu0  ;;  %v2082_v48 = vld [vmem:[%s2283_s27] sm:$0xff]  }
 0x681   : > { %v1035_v50 = vpop.f32.mrb[10].mxu0  ;;  %v2083_v49 = vld [vmem:[%s2283_s27 + $0x8] sm:$0xff]  }
 0x682   : > { %v1980_v51 = vpop.f32.mrb[11].mxu0  ;;  %v2084_v50 = vld [vmem:[%s2283_s27 + $0x10] sm:$0xff]  }
 0x683   : > { %v2085_v51 = vld [vmem:[%s2283_s27 + $0x18] sm:$0xff]  }
 0x687   : > { %v1146_v52 = vpop.f32.mrb[12].mxu0 }
 0x688   : > { %1153 = vrot.lane.b32.xlu0 %v1146_v52, %s2139_s21  ;;  %v1991_v53 = vpop.f32.mrb[13].mxu0  ;;  %v2086_v52 = vld [vmem:[%s2283_s27 + $0x20] sm:$0xff]  }
 0x689   : > { %v1149_v54 = vpop.f32.mrb[14].mxu0  ;;  %v2087_v53 = vld [vmem:[%s2283_s27 + $0x28] sm:$0xff]  }
 0x68a   : > { %v1992_v55 = vpop.f32.mrb[15].mxu0  ;;  %v2088_v54 = vld [vmem:[%s2283_s27 + $0x30] sm:$0xff]  }
 0x68b   : > { %v2089_v55 = vld [vmem:[%s2283_s27 + $0x38] sm:$0xff]  }
 0x68f   : > { %v1275_v56 = vpop.f32.mrb[16].mxu0 }
 0x690   : > { %1281 = vst.msk [vmem:[#allocation3 + $0x8] sm:$0xff] %vm927_vm5, %v1275_v56  ;;  %v2003_v57 = vpop.f32.mrb[17].mxu0  ;;  %v1893_v56 = vld [vmem:[%s670_s8] ss:$0 sm:$0xff] }
 0x691   : > { %v1278_v58 = vpop.f32.mrb[18].mxu0 }
 0x692   : > { %v2004_v59 = vpop.f32.mrb[19].mxu0 }
 0x6b7   : > { %v1389_v63 = vpop.f32.mrb[20].mxu0 }
 0x6b8   : > { %1396 = vrot.lane.b32.xlu1 %v1389_v63, %s2139_s21  ;;  %v2015_v0 = vpop.f32.mrb[21].mxu0 }
 0x6b9   : > { %v1392_v1 = vpop.f32.mrb[22].mxu0 }
 0x6ba   : > { %v2016_v2 = vpop.f32.mrb[23].mxu0 }
 0x6fa   : > { %v1154_v3 = vpop.permute.xlu0 %1153 }
 0x6fb   : > { %1157 = vst.msk [vmem:[#allocation3] sm:$0xff] %vm1156_vm1, %v1154_v3 }
 0x702   : > { %v1400_v6 = vld [vmem:[#allocation3] sm:$0xff] }
 0x72a   : > { %v1397_v4 = vpop.permute.xlu1 %1396 }
 0x72b   : > { %1399 = vst.msk [vmem:[#allocation3 + $0x8] sm:$0xff] %vm1156_vm1, %v1397_v4 }
 0x732   : > { %v1401_v8 = vld [vmem:[#allocation3 + $0x8] sm:$0xff] }
 0x733   : > { %v1402_v9 = vpack.c.bf16 %v1401_v8, %v1400_v6 }
 0x735   : > { %2022 = vmatmul.mubr.msk.bf16.vlgmr.msra.gmra.mrb[12].mxu1 %vm766_vm3, %v1402_v9 }
 0x736   : > { %2049 = vmatprep.mubr.msk.bf16.mxu1 %vm2131_vm4, %v2130_v60  ;;  %2034 = vmatpush3.bf16.msra.mxu1 %v2082_v48 }
 0x737   : > { %2035 = vmatprep.subr.bf16.mxu1 %v2130_v60 }
 0x73a   : > { %2036 = vmatpush3.bf16.msra.mxu1 %v2083_v49 }
 0x73b   : > { %2037 = vmatprep.subr.bf16.mxu1 %v2130_v60 }
 0x73e   : > { %2038 = vmatpush3.bf16.msra.mxu1 %v2084_v50 }
 0x73f   : > { %2039 = vmatprep.subr.bf16.mxu1 %v2130_v60 }
 0x742   : > { %2040 = vmatpush3.bf16.msra.mxu1 %v2085_v51 }
 0x743   : > { %2041 = vmatprep.subr.bf16.mxu1 %v2130_v60 }
 0x746   : > { %2042 = vmatpush3.bf16.msra.mxu1 %v2086_v52 }
 0x747   : > { %2043 = vmatprep.subr.bf16.mxu1 %v2130_v60 }
 0x74a   : > { %2044 = vmatpush3.bf16.msra.mxu1 %v2087_v53 }
 0x74b   : > { %2045 = vmatprep.subr.bf16.mxu1 %v2130_v60 }
 0x74e   : > { %2046 = vmatpush3.bf16.msra.mxu1 %v2088_v54 }
 0x74f   : > { %2047 = vmatprep.subr.bf16.mxu1 %v2130_v60 }
 0x752   : > { %2048 = vmatpush3.bf16.msra.mxu1 %v2089_v55 }
 0x808   : > { %v1463_v11 = vpop.f32.mrb[12].mxu1 }
 0x809   : > { %v1464_v13 = vadd.f32 %v1887_v10, %v1463_v11  ;;  %v2023_v15 = vpop.f32.mrb[13].mxu1 }
 0x80a   : > { %v1466_v16 = vpop.f32.mrb[14].mxu1 }
 0x80b   : > { %v2444_v17 = vadd.f32 %v1464_v13, %v2316_v12  ;;  %v1467_v18 = vadd.f32 %v1887_v10, %v1466_v16  ;;  %v2024_v19 = vpop.f32.mrb[15].mxu1 }
 0x80d   : > { %v2447_v20 = vadd.f32 %v1467_v18, %v2321_v14  ;;  %v1474_v21 = vsel %vm766_vm3, %v2444_v17, 0.0 }
 0x80e   : > { %1475 = vadd.xlane.f32.xlu0 %v1474_v21 }
 0x80f   : > { %v1477_v22 = vsel %vm766_vm3, %v2447_v20, 0.0 }
 0x810   : > { %1478 = vadd.xlane.f32.xlu1 %v1477_v22 }
 0x89b   : > { %v1476_v23 = vpop.xlane.xlu0 %1475 }
 0x89c   : > { %v1480_v24 = vmul.f32 0.03125, %v1476_v23 }
 0x89d   : > { %v1479_v25 = vpop.xlane.xlu1 %1478 }
 0x89e   : > { %v1482_v12 = vsub.f32 %v2444_v17, %v1480_v24  ;;  %v1481_v26 = vmul.f32 0.03125, %v1479_v25  ;;  %v1897_v24 = vld [vmem:[%s678_s0] ss:$0 sm:$0xff] }
 0x8a0   : > { %v1483_v27 = vsub.f32 %v2447_v20, %v1481_v26  ;;  %v1484_v14 = vmul.f32 %v1482_v12, %v1482_v12 }
 0x8a2   : > { %v1486_v28 = vsel %vm766_vm3, %v1484_v14, 0.0  ;;  %v1485_v29 = vmul.f32 %v1483_v27, %v1483_v27 }
 0x8a3   : > { %1487 = vadd.xlane.f32.xlu0 %v1486_v28 }
 0x8a4   : > { %v1489_v30 = vsel %vm766_vm3, %v1485_v29, 0.0 }
 0x8a7   : > { %1490 = vadd.xlane.f32.xlu0 %v1489_v30 }
 0x930   : > { %v1488_v32 = vpop.xlane.xlu0 %1487 }
 0x931   : > { %v1492_v33 = vmul.f32 0.03125, %v1488_v32 }
 0x933   : > { %v1494_v34 = vadd.f32 1e-05, %v1492_v33 }
 0x934   : > { %v1491_v7 = vpop.xlane.xlu0 %1490 }
 0x935   : > { %2112 = vrsqrt.f32 %v1494_v34  ;;  %v1493_v35 = vmul.f32 0.03125, %v1491_v7 }
 0x937   : > { %v1495_v36 = vadd.f32 1e-05, %v1493_v35 }
 0x939   : > { %2114 = vrsqrt.f32 %v1495_v36 }
 0x93f   : > { %v2113_v37 = vpop.eup %2112 }
 0x940   : > { %v1498_v38 = vmul.f32 %v2113_v37, %v1482_v12 }
 0x942   : > { %v1506_v41 = vmul.f32 %v1891_v39, %v1498_v38 }
 0x943   : > { %v2115_v40 = vpop.eup %2114 }
 0x944   : > { %v1499_v42 = vmul.f32 %v2115_v40, %v1483_v27  ;;  %v1514_v45 = vadd.f32 %v1892_v43, %v1506_v41 }
 0x946   : > { %v1507_v44 = vmul.f32 %v1891_v39, %v1499_v42 }
 0x948   : > { %v1515_v46 = vadd.f32 %v1892_v43, %v1507_v44 }
 0x94a   : > { %v1516_v47 = vpack.c.bf16 %v1515_v46, %v1514_v45 }
 0x94c   : > { %2030 = vmatmul.mubr.msk.bf16.vlgmr.msra.gmra.mrb[24].mxu0 %vm766_vm3, %v1516_v47 }
 0xa1f   : > { %v1577_v57 = vpop.f32.mrb[24].mxu0 }
 0xa20   : > { %v1578_v58 = vadd.f32 %v1893_v56, %v1577_v57  ;;  %v2031_v59 = vpop.f32.mrb[25].mxu0 }
 0xa21   : > { %v1580_v61 = vpop.f32.mrb[26].mxu0 }
 0xa22   : > { %v1584_v62 = vmul.f32 %v1578_v58, %v1578_v58  ;;  %v1581_v63 = vadd.f32 %v1893_v56, %v1580_v61  ;;  %v2032_v0 = vpop.f32.mrb[27].mxu0 }
 0xa24   : > { %v1586_v1 = vmul.f32 %v1584_v62, %v1578_v58  ;;  %v1585_v2 = vmul.f32 %v1581_v63, %v1581_v63 }
 0xa26   : > { %v1588_v3 = vmul.f32 0.044715, %v1586_v1  ;;  %v1587_v4 = vmul.f32 %v1585_v2, %v1581_v63 }
 0xa28   : > { %v1590_v6 = vadd.f32 %v1588_v3, %v1578_v58  ;;  %v1589_v60 = vmul.f32 0.044715, %v1587_v4 }
 0xa2a   : > { %v1592_v8 = vmul.f32 0.7978846, %v1590_v6  ;;  %v1591_v9 = vadd.f32 %v1589_v60, %v1581_v63 }
 0xa2c   : > { %2116 = vtanh.f32 %v1592_v8  ;;  %v1593_v10 = vmul.f32 0.7978846, %v1591_v9 }
 0xa2e   : > { %2118 = vtanh.f32 %v1593_v10 }
 0xa36   : > { %v2117_v11 = vpop.eup %2116 }
 0xa37   : > { %v1596_v13 = vadd.f32 1.0, %v2117_v11 }
 0xa38   : > { %v2119_v15 = vpop.eup %2118 }
 0xa39   : > { %v1598_v16 = vmul.f32 0.5, %v1596_v13  ;;  %v1597_v18 = vadd.f32 1.0, %v2119_v15 }
 0xa3b   : > { %v1599_v19 = vmul.f32 0.5, %v1597_v18  ;;  %v1600_v21 = vmul.f32 %v1598_v16, %v1578_v58 }
 0xa3d   : > { %v1601_v22 = vmul.f32 %v1599_v19, %v1581_v63 }
 0xa3f   : > { %v1602_v23 = vpack.c.bf16 %v1601_v22, %v1600_v21 }
 0xa41   : > { %2050 = vmatmul.mubr.bf16.vlgmr.msra.gmra.mrb[16].mxu1 %v1602_v23 }
 0xb14   : > { %v1708_v25 = vpop.f32.mrb[16].mxu1 }
 0xb15   : > { %v1709_v12 = vadd.f32 %v1897_v24, %v1708_v25  ;;  %v2051_v26 = vpop.f32.mrb[17].mxu1 }
 0xb16   : > { %v1711_v27 = vpop.f32.mrb[18].mxu1 }
 0xb17   : > { %v1715_v14 = vadd.f32 %v1709_v12, %v2444_v17  ;;  %v1712_v28 = vadd.f32 %v1897_v24, %v1711_v27  ;;  %v2052_v29 = vpop.f32.mrb[19].mxu1 }
 0xb19   : > { %1717 = vst.msk [vmem:[%s2525_s16] sm:$0xff] %vm766_vm3, %v1715_v14  ;;  %v1716_v30 = vadd.f32 %v1712_v28, %v2447_v20 }
 0xb1b   : > { %1718 = vst.msk [vmem:[%s2525_s16 + $0x8] sm:$0xff] %vm766_vm3, %v1716_v30 }
 0xb1c PF: > { %s2552_s23 = sld [smem:[#allocation4_spill]] }
 0xb22   : > { %s26_s21 = sadd.s32 1, %s2552_s23  }
 0xb23   : > { %p23_p5 = scmp.ge.s32.totalorder %s26_s21, 4  }
 0xb25   :  { %25 = sbr.rel (!%p23_p5) target bundleno = 7 (0x7), region = 147 }

</bundles_post_ra>
